<compile_context>
chip_gen: v7x
topology: tpu7x:2x2x1
jax: 0.10.0
libtpu: 0.0.40
codegen_flags: <defaults>
</compile_context>

<pallas_src>
import math
import functools

import jax
import jax.numpy as jnp
from jax.experimental import pallas as pl
from jax.experimental.pallas import tpu as pltpu

# ----------------------------- config (small) -------------------------------
VOCAB_SIZE = 50
D_MODEL = 32
NHEAD = 4
DIM_FF = 64
NUM_LAYERS = 2
MAX_SEQ_LEN = 16
BATCH = 2
SEQ = 8

_VMEM = pl.BlockSpec(memory_space=pltpu.MemorySpace.VMEM)


# ----------------------------- fused Pallas kernel ---------------------------
def _fused_forward_kernel(ids_ref, emb_ref, pe_ref,
                          wqkv_ref, bqkv_ref, wo_ref, bo_ref,
                          g1_ref, beta1_ref, w1_ref, b1_ref,
                          w2_ref, b2_ref, g2_ref, beta2_ref,
                          hw1_ref, hb1_ref, hw2_ref, hb2_ref,
                          o_ref, *, nhead, num_layers, batch, seq):
    bs = batch * seq
    vocab, d = emb_ref.shape
    hd = d // nhead
    scale = 1.0 / math.sqrt(hd)

    # --- embedding gather as one-hot matmul + sqrt(d) scale + pos-enc add ---
    ids = ids_ref[...]                                            # (BS, 1) int32
    tok_iota = jax.lax.broadcasted_iota(jnp.int32, (bs, vocab), 1)
    onehot = (tok_iota == ids).astype(jnp.float32)                # (BS, V)
    x = jnp.dot(onehot, emb_ref[...], preferred_element_type=jnp.float32)
    x = x * math.sqrt(d) + pe_ref[...]                            # (BS, D)

    # --- N x post-norm TransformerEncoderLayer; x stays resident in VMEM ----
    for l in range(num_layers):
        # one wide QKV projection over the fused (BS, D) slab
        qkv = jnp.dot(x, wqkv_ref[l],
                      preferred_element_type=jnp.float32) + bqkv_ref[l]

        # per-head attention (batched over B via einsum); head contexts stay
        # as values — no VMEM scratch, no masked partial stores
        head_ctx = []
        for h in range(nhead):
            q = qkv[:, h * hd:(h + 1) * hd].reshape(batch, seq, hd)
            k = qkv[:, d + h * hd:d + (h + 1) * hd].reshape(batch, seq, hd)
            v = qkv[:, 2 * d + h * hd:2 * d + (h + 1) * hd].reshape(batch, seq, hd)
            s = jnp.einsum('bqd,bkd->bqk', q, k,
                           preferred_element_type=jnp.float32) * scale
            s = s - jnp.max(s, axis=-1, keepdims=True)
            p = jnp.exp(s)
            p = p * pl.reciprocal(jnp.sum(p, axis=-1, keepdims=True), approx=True)
            ctx = jnp.einsum('bqk,bkd->bqd', p, v,
                             preferred_element_type=jnp.float32)  # (B, S, hd)
            head_ctx.append(ctx.reshape(bs, hd))
        ctx_all = jnp.concatenate(head_ctx, axis=-1)              # (BS, D)

        # single fused output projection
        attn = jnp.dot(ctx_all, wo_ref[l],
                       preferred_element_type=jnp.float32) + bo_ref[l]

        # residual + LayerNorm1 (eps=1e-5, biased variance)
        y = x + attn
        mu = jnp.mean(y, axis=-1, keepdims=True)
        var = jnp.mean((y - mu) ** 2, axis=-1, keepdims=True)
        y = (y - mu) * jax.lax.rsqrt(var + 1e-5) * g1_ref[l] + beta1_ref[l]

        # feed-forward (ReLU), one wide matmul per projection
        f = jnp.dot(y, w1_ref[l], preferred_element_type=jnp.float32) + b1_ref[l]
        f = jnp.maximum(f, 0.0)
        f = jnp.dot(f, w2_ref[l], preferred_element_type=jnp.float32) + b2_ref[l]

        # residual + LayerNorm2
        z = y + f
        mu2 = jnp.mean(z, axis=-1, keepdims=True)
        var2 = jnp.mean((z - mu2) ** 2, axis=-1, keepdims=True)
        x = (z - mu2) * jax.lax.rsqrt(var2 + 1e-5) * g2_ref[l] + beta2_ref[l]

    # --- mean pool over seq (expressed as a tiny matmul) + MLP head ----------
    j = jax.lax.broadcasted_iota(jnp.int32, (batch, bs), 1)
    b_idx = jax.lax.broadcasted_iota(jnp.int32, (batch, bs), 0)
    pool = ((j >= b_idx * seq) & (j < (b_idx + 1) * seq)).astype(jnp.float32)
    pool = pool * (1.0 / seq)                                     # (B, BS)
    pooled = jnp.dot(pool, x, preferred_element_type=jnp.float32)  # (B, D)

    hid = jnp.dot(pooled, hw1_ref[...],
                  preferred_element_type=jnp.float32) + hb1_ref[...]
    hid = jnp.maximum(hid, 0.0)
    o_ref[...] = jnp.dot(hid, hw2_ref[...],
                         preferred_element_type=jnp.float32) + hb2_ref[...]


# ----------------------------- wrapper ---------------------------------------
def forward(inputs, params):
    B, S = inputs.shape
    D = D_MODEL
    ids = inputs.reshape(B * S, 1).astype(jnp.int32)
    # PE quirk of the reference model: pe[:B] (batch-indexed), broadcast over S.
    pe_flat = jnp.broadcast_to(params["pe"][:B], (B, S, D)).reshape(B * S, D)

    kernel = functools.partial(_fused_forward_kernel, nhead=NHEAD,
                               num_layers=NUM_LAYERS, batch=B, seq=S)
    args = (ids, params["embedding"], pe_flat,
            params["wqkv"], params["bqkv"], params["wo"], params["bo"],
            params["g1"], params["beta1"], params["w1"], params["b1"],
            params["w2"], params["b2"], params["g2"], params["beta2"],
            params["head"]["w1"], params["head"]["b1"],
            params["head"]["w2"], params["head"]["b2"])
    return pl.pallas_call(
        kernel,
        out_shape=jax.ShapeDtypeStruct((B, 2), jnp.float32),
        in_specs=[_VMEM] * len(args),
        out_specs=_VMEM,
    )(*args)


# ----------------------------- params / glue ---------------------------------
def make_positional_encoding(max_len, d_model):
    position = jnp.arange(max_len, dtype=jnp.float32)[:, None]
    div_term = jnp.exp(jnp.arange(0, d_model, 2, dtype=jnp.float32)
                       * (-math.log(10000.0) / d_model))
    pe = jnp.zeros((max_len, d_model), jnp.float32)
    pe = pe.at[:, 0::2].set(jnp.sin(position * div_term))
    pe = pe.at[:, 1::2].set(jnp.cos(position * div_term))
    return pe[:, None, :]      # (max_len, 1, d_model) == pe.unsqueeze(0).transpose(0,1)


def init_params(key):
    def dense(k, shape):
        return jax.random.normal(k, shape, jnp.float32) * 0.02

    keys = jax.random.split(key, 2 + NUM_LAYERS)
    layers = []
    for i in range(NUM_LAYERS):
        lk = jax.random.split(keys[2 + i], 4)
        layers.append(dict(
            wqkv=dense(lk[0], (D_MODEL, 3 * D_MODEL)),      # in_proj_weight.T
            bqkv=jnp.zeros((1, 3 * D_MODEL), jnp.float32),
            wo=dense(lk[1], (D_MODEL, D_MODEL)),            # out_proj.weight.T
            bo=jnp.zeros((1, D_MODEL), jnp.float32),
            g1=jnp.ones((1, D_MODEL), jnp.float32),
            beta1=jnp.zeros((1, D_MODEL), jnp.float32),
            w1=dense(lk[2], (D_MODEL, DIM_FF)),
            b1=jnp.zeros((1, DIM_FF), jnp.float32),
            w2=dense(lk[3], (DIM_FF, D_MODEL)),
            b2=jnp.zeros((1, D_MODEL), jnp.float32),
            g2=jnp.ones((1, D_MODEL), jnp.float32),
            beta2=jnp.zeros((1, D_MODEL), jnp.float32),
        ))
    stacked = {name: jnp.stack([lyr[name] for lyr in layers])   # leading layer dim
               for name in layers[0]}

    hk = jax.random.split(keys[1], 2)
    hidden = D_MODEL // 3                                       # 32 // 3 = 10
    params = dict(
        embedding=dense(keys[0], (VOCAB_SIZE, D_MODEL)),
        pe=make_positional_encoding(MAX_SEQ_LEN, D_MODEL),
        head=dict(
            w1=dense(hk[0], (D_MODEL, hidden)),
            b1=jnp.zeros((1, hidden), jnp.float32),
            w2=dense(hk[1], (hidden, 2)),
            b2=jnp.zeros((1, 2), jnp.float32),
        ),
        **stacked,
    )
    return params


# ----------------------------- main -------------------------------------------
if __name__ == "__main__":
    key = jax.random.PRNGKey(0)
    pkey, ikey = jax.random.split(key)
    params = init_params(pkey)
    inputs = jax.random.randint(ikey, (BATCH, SEQ), 0, VOCAB_SIZE, dtype=jnp.int32)

    fwd = jax.jit(forward)
    out = fwd(inputs, params)
    out = jax.block_until_ready(out)
    assert out.shape == (BATCH, 2) and out.dtype == jnp.float32
    assert bool(jnp.all(jnp.isfinite(out)))
    print("KERNEL_OK")
</pallas_src>

<mosaic_0001>
module attributes {stable_mosaic.version = 11 : i64} {
  func.func @_fused_forward_kernel(%arg0: memref<16x1xi32, #tpu.memory_space<vmem>>, %arg1: memref<50x32xf32, #tpu.memory_space<vmem>>, %arg2: memref<16x32xf32, #tpu.memory_space<vmem>>, %arg3: memref<2x32x96xf32, #tpu.memory_space<vmem>>, %arg4: memref<2x1x96xf32, #tpu.memory_space<vmem>>, %arg5: memref<2x32x32xf32, #tpu.memory_space<vmem>>, %arg6: memref<2x1x32xf32, #tpu.memory_space<vmem>>, %arg7: memref<2x1x32xf32, #tpu.memory_space<vmem>>, %arg8: memref<2x1x32xf32, #tpu.memory_space<vmem>>, %arg9: memref<2x32x64xf32, #tpu.memory_space<vmem>>, %arg10: memref<2x1x64xf32, #tpu.memory_space<vmem>>, %arg11: memref<2x64x32xf32, #tpu.memory_space<vmem>>, %arg12: memref<2x1x32xf32, #tpu.memory_space<vmem>>, %arg13: memref<2x1x32xf32, #tpu.memory_space<vmem>>, %arg14: memref<2x1x32xf32, #tpu.memory_space<vmem>>, %arg15: memref<32x10xf32, #tpu.memory_space<vmem>>, %arg16: memref<1x10xf32, #tpu.memory_space<vmem>>, %arg17: memref<10x2xf32, #tpu.memory_space<vmem>>, %arg18: memref<1x2xf32, #tpu.memory_space<vmem>>, %arg19: memref<2x2xf32, #tpu.memory_space<vmem>>) attributes {dimension_semantics = [], scalar_prefetch = 0 : i64, scratch_operands = 0 : i64, tpu.core_type = #tpu.core_type<tc>} {
    %c0 = arith.constant 0 : index
    %c0_0 = arith.constant 0 : index
    %0 = vector.load %arg0[%c0, %c0_0] : memref<16x1xi32, #tpu.memory_space<vmem>>, vector<16x1xi32>
    %1 = tpu.iota {dimensions = array<i32: 1>} : vector<16x50xi32>
    %2 = vector.broadcast %0 : vector<16x1xi32> to vector<16x50xi32>
    %3 = arith.cmpi eq, %1, %2 : vector<16x50xi32>
    %4 = arith.extui %3 : vector<16x50xi1> to vector<16x50xi32>
    %5 = arith.sitofp %4 : vector<16x50xi32> to vector<16x50xf32>
    %c0_1 = arith.constant 0 : index
    %c0_2 = arith.constant 0 : index
    %6 = vector.load %arg1[%c0_1, %c0_2] : memref<50x32xf32, #tpu.memory_space<vmem>>, vector<50x32xf32>
    %cst = arith.constant dense<0.000000e+00> : vector<16x32xf32>
    %7 = tpu.matmul %5, %6, %cst {dimension_numbers = #tpu.dot_dimension_numbers<[1], [0], [0], [1], [0, 0, 1, 1], [], []>} : vector<16x50xf32>, vector<50x32xf32>, vector<16x32xf32> -> vector<16x32xf32>
    %cst_3 = arith.constant 5.65685415 : f32
    %8 = vector.broadcast %cst_3 : f32 to vector<16x32xf32>
    %9 = arith.mulf %7, %8 : vector<16x32xf32>
    %c0_4 = arith.constant 0 : index
    %c0_5 = arith.constant 0 : index
    %10 = vector.load %arg2[%c0_4, %c0_5] : memref<16x32xf32, #tpu.memory_space<vmem>>, vector<16x32xf32>
    %11 = arith.addf %9, %10 : vector<16x32xf32>
    %c0_6 = arith.constant 0 : index
    %c0_7 = arith.constant 0 : index
    %c0_8 = arith.constant 0 : index
    %12 = vector.load %arg3[%c0_6, %c0_7, %c0_8] : memref<2x32x96xf32, #tpu.memory_space<vmem>>, vector<1x32x96xf32>
    %13 = vector.shape_cast %12 : vector<1x32x96xf32> to vector<32x96xf32>
    %cst_9 = arith.constant dense<0.000000e+00> : vector<16x96xf32>
    %14 = tpu.matmul %11, %13, %cst_9 {dimension_numbers = #tpu.dot_dimension_numbers<[1], [0], [0], [1], [0, 0, 1, 1], [], []>} : vector<16x32xf32>, vector<32x96xf32>, vector<16x96xf32> -> vector<16x96xf32>
    %c0_10 = arith.constant 0 : index
    %c0_11 = arith.constant 0 : index
    %c0_12 = arith.constant 0 : index
    %15 = vector.load %arg4[%c0_10, %c0_11, %c0_12] : memref<2x1x96xf32, #tpu.memory_space<vmem>>, vector<1x1x96xf32>
    %16 = vector.shape_cast %15 : vector<1x1x96xf32> to vector<1x96xf32>
    %17 = vector.broadcast %16 : vector<1x96xf32> to vector<16x96xf32>
    %18 = arith.addf %14, %17 : vector<16x96xf32>
    %19 = vector.extract_strided_slice %18 {offsets = [0, 0], sizes = [16, 8], strides = [1, 1]} : vector<16x96xf32> to vector<16x8xf32>
    %20 = vector.shape_cast %19 : vector<16x8xf32> to vector<2x8x8xf32>
    %21 = vector.extract_strided_slice %18 {offsets = [0, 32], sizes = [16, 8], strides = [1, 1]} : vector<16x96xf32> to vector<16x8xf32>
    %22 = vector.shape_cast %21 : vector<16x8xf32> to vector<2x8x8xf32>
    %23 = vector.extract_strided_slice %18 {offsets = [0, 64], sizes = [16, 8], strides = [1, 1]} : vector<16x96xf32> to vector<16x8xf32>
    %24 = vector.shape_cast %23 : vector<16x8xf32> to vector<2x8x8xf32>
    "tpu.trace_start"() <{level = 10 : i32, message = "bqd,bkd->bqk"}> : () -> ()
    %cst_13 = arith.constant dense<0.000000e+00> : vector<2x8x8xf32>
    %25 = tpu.matmul %20, %22, %cst_13 {dimension_numbers = #tpu.dot_dimension_numbers<[2], [2], [1], [1], [0, 0, 0, 1, 1, 1], [0], [0]>} : vector<2x8x8xf32>, vector<2x8x8xf32>, vector<2x8x8xf32> -> vector<2x8x8xf32>
    "tpu.trace_stop"() : () -> ()
    %cst_14 = arith.constant 0.353553385 : f32
    %26 = vector.broadcast %cst_14 : f32 to vector<2x8x8xf32>
    %27 = arith.mulf %25, %26 : vector<2x8x8xf32>
    %cst_15 = arith.constant dense<0xFF800000> : vector<2x8xf32>
    %28 = vector.multi_reduction <maximumf>, %27, %cst_15 [2] : vector<2x8x8xf32> to vector<2x8xf32>
    %29 = vector.shape_cast %28 : vector<2x8xf32> to vector<2x8x1xf32>
    %30 = vector.broadcast %29 : vector<2x8x1xf32> to vector<2x8x8xf32>
    %31 = arith.subf %27, %30 : vector<2x8x8xf32>
    %32 = math.exp %31 : vector<2x8x8xf32>
    %cst_16 = arith.constant dense<0.000000e+00> : vector<2x8xf32>
    %33 = vector.multi_reduction <add>, %32, %cst_16 [2] : vector<2x8x8xf32> to vector<2x8xf32>
    %34 = vector.shape_cast %33 : vector<2x8xf32> to vector<2x8x1xf32>
    %35 = tpu.reciprocal %34 {approx = true} : vector<2x8x1xf32> -> vector<2x8x1xf32>
    %36 = vector.broadcast %35 : vector<2x8x1xf32> to vector<2x8x8xf32>
    %37 = arith.mulf %32, %36 : vector<2x8x8xf32>
    "tpu.trace_start"() <{level = 10 : i32, message = "bqk,bkd->bqd"}> : () -> ()
    %cst_17 = arith.constant dense<0.000000e+00> : vector<2x8x8xf32>
    %38 = tpu.matmul %37, %24, %cst_17 {dimension_numbers = #tpu.dot_dimension_numbers<[2], [1], [1], [2], [0, 0, 0, 1, 1, 2], [0], [0]>} : vector<2x8x8xf32>, vector<2x8x8xf32>, vector<2x8x8xf32> -> vector<2x8x8xf32>
    "tpu.trace_stop"() : () -> ()
    %39 = vector.shape_cast %38 : vector<2x8x8xf32> to vector<16x8xf32>
    %40 = vector.extract_strided_slice %18 {offsets = [0, 8], sizes = [16, 8], strides = [1, 1]} : vector<16x96xf32> to vector<16x8xf32>
    %41 = vector.shape_cast %40 : vector<16x8xf32> to vector<2x8x8xf32>
    %42 = vector.extract_strided_slice %18 {offsets = [0, 40], sizes = [16, 8], strides = [1, 1]} : vector<16x96xf32> to vector<16x8xf32>
    %43 = vector.shape_cast %42 : vector<16x8xf32> to vector<2x8x8xf32>
    %44 = vector.extract_strided_slice %18 {offsets = [0, 72], sizes = [16, 8], strides = [1, 1]} : vector<16x96xf32> to vector<16x8xf32>
    %45 = vector.shape_cast %44 : vector<16x8xf32> to vector<2x8x8xf32>
    "tpu.trace_start"() <{level = 10 : i32, message = "bqd,bkd->bqk"}> : () -> ()
    %cst_18 = arith.constant dense<0.000000e+00> : vector<2x8x8xf32>
    %46 = tpu.matmul %41, %43, %cst_18 {dimension_numbers = #tpu.dot_dimension_numbers<[2], [2], [1], [1], [0, 0, 0, 1, 1, 1], [0], [0]>} : vector<2x8x8xf32>, vector<2x8x8xf32>, vector<2x8x8xf32> -> vector<2x8x8xf32>
    "tpu.trace_stop"() : () -> ()
    %cst_19 = arith.constant 0.353553385 : f32
    %47 = vector.broadcast %cst_19 : f32 to vector<2x8x8xf32>
    %48 = arith.mulf %46, %47 : vector<2x8x8xf32>
    %cst_20 = arith.constant dense<0xFF800000> : vector<2x8xf32>
    %49 = vector.multi_reduction <maximumf>, %48, %cst_20 [2] : vector<2x8x8xf32> to vector<2x8xf32>
    %50 = vector.shape_cast %49 : vector<2x8xf32> to vector<2x8x1xf32>
    %51 = vector.broadcast %50 : vector<2x8x1xf32> to vector<2x8x8xf32>
    %52 = arith.subf %48, %51 : vector<2x8x8xf32>
    %53 = math.exp %52 : vector<2x8x8xf32>
    %cst_21 = arith.constant dense<0.000000e+00> : vector<2x8xf32>
    %54 = vector.multi_reduction <add>, %53, %cst_21 [2] : vector<2x8x8xf32> to vector<2x8xf32>
    %55 = vector.shape_cast %54 : vector<2x8xf32> to vector<2x8x1xf32>
    %56 = tpu.reciprocal %55 {approx = true} : vector<2x8x1xf32> -> vector<2x8x1xf32>
    %57 = vector.broadcast %56 : vector<2x8x1xf32> to vector<2x8x8xf32>
    %58 = arith.mulf %53, %57 : vector<2x8x8xf32>
    "tpu.trace_start"() <{level = 10 : i32, message = "bqk,bkd->bqd"}> : () -> ()
    %cst_22 = arith.constant dense<0.000000e+00> : vector<2x8x8xf32>
    %59 = tpu.matmul %58, %45, %cst_22 {dimension_numbers = #tpu.dot_dimension_numbers<[2], [1], [1], [2], [0, 0, 0, 1, 1, 2], [0], [0]>} : vector<2x8x8xf32>, vector<2x8x8xf32>, vector<2x8x8xf32> -> vector<2x8x8xf32>
    "tpu.trace_stop"() : () -> ()
    %60 = vector.shape_cast %59 : vector<2x8x8xf32> to vector<16x8xf32>
    %61 = vector.extract_strided_slice %18 {offsets = [0, 16], sizes = [16, 8], strides = [1, 1]} : vector<16x96xf32> to vector<16x8xf32>
    %62 = vector.shape_cast %61 : vector<16x8xf32> to vector<2x8x8xf32>
    %63 = vector.extract_strided_slice %18 {offsets = [0, 48], sizes = [16, 8], strides = [1, 1]} : vector<16x96xf32> to vector<16x8xf32>
    %64 = vector.shape_cast %63 : vector<16x8xf32> to vector<2x8x8xf32>
    %65 = vector.extract_strided_slice %18 {offsets = [0, 80], sizes = [16, 8], strides = [1, 1]} : vector<16x96xf32> to vector<16x8xf32>
    %66 = vector.shape_cast %65 : vector<16x8xf32> to vector<2x8x8xf32>
    "tpu.trace_start"() <{level = 10 : i32, message = "bqd,bkd->bqk"}> : () -> ()
    %cst_23 = arith.constant dense<0.000000e+00> : vector<2x8x8xf32>
    %67 = tpu.matmul %62, %64, %cst_23 {dimension_numbers = #tpu.dot_dimension_numbers<[2], [2], [1], [1], [0, 0, 0, 1, 1, 1], [0], [0]>} : vector<2x8x8xf32>, vector<2x8x8xf32>, vector<2x8x8xf32> -> vector<2x8x8xf32>
    "tpu.trace_stop"() : () -> ()
    %cst_24 = arith.constant 0.353553385 : f32
    %68 = vector.broadcast %cst_24 : f32 to vector<2x8x8xf32>
    %69 = arith.mulf %67, %68 : vector<2x8x8xf32>
    %cst_25 = arith.constant dense<0xFF800000> : vector<2x8xf32>
    %70 = vector.multi_reduction <maximumf>, %69, %cst_25 [2] : vector<2x8x8xf32> to vector<2x8xf32>
    %71 = vector.shape_cast %70 : vector<2x8xf32> to vector<2x8x1xf32>
    %72 = vector.broadcast %71 : vector<2x8x1xf32> to vector<2x8x8xf32>
    %73 = arith.subf %69, %72 : vector<2x8x8xf32>
    %74 = math.exp %73 : vector<2x8x8xf32>
    %cst_26 = arith.constant dense<0.000000e+00> : vector<2x8xf32>
    %75 = vector.multi_reduction <add>, %74, %cst_26 [2] : vector<2x8x8xf32> to vector<2x8xf32>
    %76 = vector.shape_cast %75 : vector<2x8xf32> to vector<2x8x1xf32>
    %77 = tpu.reciprocal %76 {approx = true} : vector<2x8x1xf32> -> vector<2x8x1xf32>
    %78 = vector.broadcast %77 : vector<2x8x1xf32> to vector<2x8x8xf32>
    %79 = arith.mulf %74, %78 : vector<2x8x8xf32>
    "tpu.trace_start"() <{level = 10 : i32, message = "bqk,bkd->bqd"}> : () -> ()
    %cst_27 = arith.constant dense<0.000000e+00> : vector<2x8x8xf32>
    %80 = tpu.matmul %79, %66, %cst_27 {dimension_numbers = #tpu.dot_dimension_numbers<[2], [1], [1], [2], [0, 0, 0, 1, 1, 2], [0], [0]>} : vector<2x8x8xf32>, vector<2x8x8xf32>, vector<2x8x8xf32> -> vector<2x8x8xf32>
    "tpu.trace_stop"() : () -> ()
    %81 = vector.shape_cast %80 : vector<2x8x8xf32> to vector<16x8xf32>
    %82 = vector.extract_strided_slice %18 {offsets = [0, 24], sizes = [16, 8], strides = [1, 1]} : vector<16x96xf32> to vector<16x8xf32>
    %83 = vector.shape_cast %82 : vector<16x8xf32> to vector<2x8x8xf32>
    %84 = vector.extract_strided_slice %18 {offsets = [0, 56], sizes = [16, 8], strides = [1, 1]} : vector<16x96xf32> to vector<16x8xf32>
    %85 = vector.shape_cast %84 : vector<16x8xf32> to vector<2x8x8xf32>
    %86 = vector.extract_strided_slice %18 {offsets = [0, 88], sizes = [16, 8], strides = [1, 1]} : vector<16x96xf32> to vector<16x8xf32>
    %87 = vector.shape_cast %86 : vector<16x8xf32> to vector<2x8x8xf32>
    "tpu.trace_start"() <{level = 10 : i32, message = "bqd,bkd->bqk"}> : () -> ()
    %cst_28 = arith.constant dense<0.000000e+00> : vector<2x8x8xf32>
    %88 = tpu.matmul %83, %85, %cst_28 {dimension_numbers = #tpu.dot_dimension_numbers<[2], [2], [1], [1], [0, 0, 0, 1, 1, 1], [0], [0]>} : vector<2x8x8xf32>, vector<2x8x8xf32>, vector<2x8x8xf32> -> vector<2x8x8xf32>
    "tpu.trace_stop"() : () -> ()
    %cst_29 = arith.constant 0.353553385 : f32
    %89 = vector.broadcast %cst_29 : f32 to vector<2x8x8xf32>
    %90 = arith.mulf %88, %89 : vector<2x8x8xf32>
    %cst_30 = arith.constant dense<0xFF800000> : vector<2x8xf32>
    %91 = vector.multi_reduction <maximumf>, %90, %cst_30 [2] : vector<2x8x8xf32> to vector<2x8xf32>
    %92 = vector.shape_cast %91 : vector<2x8xf32> to vector<2x8x1xf32>
    %93 = vector.broadcast %92 : vector<2x8x1xf32> to vector<2x8x8xf32>
    %94 = arith.subf %90, %93 : vector<2x8x8xf32>
    %95 = math.exp %94 : vector<2x8x8xf32>
    %cst_31 = arith.constant dense<0.000000e+00> : vector<2x8xf32>
    %96 = vector.multi_reduction <add>, %95, %cst_31 [2] : vector<2x8x8xf32> to vector<2x8xf32>
    %97 = vector.shape_cast %96 : vector<2x8xf32> to vector<2x8x1xf32>
    %98 = tpu.reciprocal %97 {approx = true} : vector<2x8x1xf32> -> vector<2x8x1xf32>
    %99 = vector.broadcast %98 : vector<2x8x1xf32> to vector<2x8x8xf32>
    %100 = arith.mulf %95, %99 : vector<2x8x8xf32>
    "tpu.trace_start"() <{level = 10 : i32, message = "bqk,bkd->bqd"}> : () -> ()
    %cst_32 = arith.constant dense<0.000000e+00> : vector<2x8x8xf32>
    %101 = tpu.matmul %100, %87, %cst_32 {dimension_numbers = #tpu.dot_dimension_numbers<[2], [1], [1], [2], [0, 0, 0, 1, 1, 2], [0], [0]>} : vector<2x8x8xf32>, vector<2x8x8xf32>, vector<2x8x8xf32> -> vector<2x8x8xf32>
    "tpu.trace_stop"() : () -> ()
    %102 = vector.shape_cast %101 : vector<2x8x8xf32> to vector<16x8xf32>
    %103 = tpu.concatenate %39, %60, %81, %102 in 1 : vector<16x8xf32>, vector<16x8xf32>, vector<16x8xf32>, vector<16x8xf32> -> vector<16x32xf32>
    %c0_33 = arith.constant 0 : index
    %c0_34 = arith.constant 0 : index
    %c0_35 = arith.constant 0 : index
    %104 = vector.load %arg5[%c0_33, %c0_34, %c0_35] : memref<2x32x32xf32, #tpu.memory_space<vmem>>, vector<1x32x32xf32>
    %105 = vector.shape_cast %104 : vector<1x32x32xf32> to vector<32x32xf32>
    %cst_36 = arith.constant dense<0.000000e+00> : vector<16x32xf32>
    %106 = tpu.matmul %103, %105, %cst_36 {dimension_numbers = #tpu.dot_dimension_numbers<[1], [0], [0], [1], [0, 0, 1, 1], [], []>} : vector<16x32xf32>, vector<32x32xf32>, vector<16x32xf32> -> vector<16x32xf32>
    %c0_37 = arith.constant 0 : index
    %c0_38 = arith.constant 0 : index
    %c0_39 = arith.constant 0 : index
    %107 = vector.load %arg6[%c0_37, %c0_38, %c0_39] : memref<2x1x32xf32, #tpu.memory_space<vmem>>, vector<1x1x32xf32>
    %108 = vector.shape_cast %107 : vector<1x1x32xf32> to vector<1x32xf32>
    %109 = vector.broadcast %108 : vector<1x32xf32> to vector<16x32xf32>
    %110 = arith.addf %106, %109 : vector<16x32xf32>
    %111 = arith.addf %11, %110 : vector<16x32xf32>
    %cst_40 = arith.constant dense<0.000000e+00> : vector<16xf32>
    %112 = vector.multi_reduction <add>, %111, %cst_40 [1] : vector<16x32xf32> to vector<16xf32>
    %113 = vector.shape_cast %112 : vector<16xf32> to vector<16x1xf32>
    %cst_41 = arith.constant 3.200000e+01 : f32
    %114 = vector.broadcast %cst_41 : f32 to vector<16x1xf32>
    %115 = arith.divf %113, %114 : vector<16x1xf32>
    %116 = vector.broadcast %115 : vector<16x1xf32> to vector<16x32xf32>
    %117 = arith.subf %111, %116 : vector<16x32xf32>
    %118 = arith.mulf %117, %117 : vector<16x32xf32>
    %cst_42 = arith.constant dense<0.000000e+00> : vector<16xf32>
    %119 = vector.multi_reduction <add>, %118, %cst_42 [1] : vector<16x32xf32> to vector<16xf32>
    %120 = vector.shape_cast %119 : vector<16xf32> to vector<16x1xf32>
    %cst_43 = arith.constant 3.200000e+01 : f32
    %121 = vector.broadcast %cst_43 : f32 to vector<16x1xf32>
    %122 = arith.divf %120, %121 : vector<16x1xf32>
    %123 = vector.broadcast %115 : vector<16x1xf32> to vector<16x32xf32>
    %124 = arith.subf %111, %123 : vector<16x32xf32>
    %cst_44 = arith.constant 9.99999974E-6 : f32
    %125 = vector.broadcast %cst_44 : f32 to vector<16x1xf32>
    %126 = arith.addf %122, %125 : vector<16x1xf32>
    %127 = math.rsqrt %126 : vector<16x1xf32>
    %128 = vector.broadcast %127 : vector<16x1xf32> to vector<16x32xf32>
    %129 = arith.mulf %124, %128 : vector<16x32xf32>
    %c0_45 = arith.constant 0 : index
    %c0_46 = arith.constant 0 : index
    %c0_47 = arith.constant 0 : index
    %130 = vector.load %arg7[%c0_45, %c0_46, %c0_47] : memref<2x1x32xf32, #tpu.memory_space<vmem>>, vector<1x1x32xf32>
    %131 = vector.shape_cast %130 : vector<1x1x32xf32> to vector<1x32xf32>
    %132 = vector.broadcast %131 : vector<1x32xf32> to vector<16x32xf32>
    %133 = arith.mulf %129, %132 : vector<16x32xf32>
    %c0_48 = arith.constant 0 : index
    %c0_49 = arith.constant 0 : index
    %c0_50 = arith.constant 0 : index
    %134 = vector.load %arg8[%c0_48, %c0_49, %c0_50] : memref<2x1x32xf32, #tpu.memory_space<vmem>>, vector<1x1x32xf32>
    %135 = vector.shape_cast %134 : vector<1x1x32xf32> to vector<1x32xf32>
    %136 = vector.broadcast %135 : vector<1x32xf32> to vector<16x32xf32>
    %137 = arith.addf %133, %136 : vector<16x32xf32>
    %c0_51 = arith.constant 0 : index
    %c0_52 = arith.constant 0 : index
    %c0_53 = arith.constant 0 : index
    %138 = vector.load %arg9[%c0_51, %c0_52, %c0_53] : memref<2x32x64xf32, #tpu.memory_space<vmem>>, vector<1x32x64xf32>
    %139 = vector.shape_cast %138 : vector<1x32x64xf32> to vector<32x64xf32>
    %cst_54 = arith.constant dense<0.000000e+00> : vector<16x64xf32>
    %140 = tpu.matmul %137, %139, %cst_54 {dimension_numbers = #tpu.dot_dimension_numbers<[1], [0], [0], [1], [0, 0, 1, 1], [], []>} : vector<16x32xf32>, vector<32x64xf32>, vector<16x64xf32> -> vector<16x64xf32>
    %c0_55 = arith.constant 0 : index
    %c0_56 = arith.constant 0 : index
    %c0_57 = arith.constant 0 : index
    %141 = vector.load %arg10[%c0_55, %c0_56, %c0_57] : memref<2x1x64xf32, #tpu.memory_space<vmem>>, vector<1x1x64xf32>
    %142 = vector.shape_cast %141 : vector<1x1x64xf32> to vector<1x64xf32>
    %143 = vector.broadcast %142 : vector<1x64xf32> to vector<16x64xf32>
    %144 = arith.addf %140, %143 : vector<16x64xf32>
    %cst_58 = arith.constant 0.000000e+00 : f32
    %145 = vector.broadcast %cst_58 : f32 to vector<16x64xf32>
    %146 = arith.maximumf %144, %145 : vector<16x64xf32>
    %c0_59 = arith.constant 0 : index
    %c0_60 = arith.constant 0 : index
    %c0_61 = arith.constant 0 : index
    %147 = vector.load %arg11[%c0_59, %c0_60, %c0_61] : memref<2x64x32xf32, #tpu.memory_space<vmem>>, vector<1x64x32xf32>
    %148 = vector.shape_cast %147 : vector<1x64x32xf32> to vector<64x32xf32>
    %cst_62 = arith.constant dense<0.000000e+00> : vector<16x32xf32>
    %149 = tpu.matmul %146, %148, %cst_62 {dimension_numbers = #tpu.dot_dimension_numbers<[1], [0], [0], [1], [0, 0, 1, 1], [], []>} : vector<16x64xf32>, vector<64x32xf32>, vector<16x32xf32> -> vector<16x32xf32>
    %c0_63 = arith.constant 0 : index
    %c0_64 = arith.constant 0 : index
    %c0_65 = arith.constant 0 : index
    %150 = vector.load %arg12[%c0_63, %c0_64, %c0_65] : memref<2x1x32xf32, #tpu.memory_space<vmem>>, vector<1x1x32xf32>
    %151 = vector.shape_cast %150 : vector<1x1x32xf32> to vector<1x32xf32>
    %152 = vector.broadcast %151 : vector<1x32xf32> to vector<16x32xf32>
    %153 = arith.addf %149, %152 : vector<16x32xf32>
    %154 = arith.addf %137, %153 : vector<16x32xf32>
    %cst_66 = arith.constant dense<0.000000e+00> : vector<16xf32>
    %155 = vector.multi_reduction <add>, %154, %cst_66 [1] : vector<16x32xf32> to vector<16xf32>
    %156 = vector.shape_cast %155 : vector<16xf32> to vector<16x1xf32>
    %cst_67 = arith.constant 3.200000e+01 : f32
    %157 = vector.broadcast %cst_67 : f32 to vector<16x1xf32>
    %158 = arith.divf %156, %157 : vector<16x1xf32>
    %159 = vector.broadcast %158 : vector<16x1xf32> to vector<16x32xf32>
    %160 = arith.subf %154, %159 : vector<16x32xf32>
    %161 = arith.mulf %160, %160 : vector<16x32xf32>
    %cst_68 = arith.constant dense<0.000000e+00> : vector<16xf32>
    %162 = vector.multi_reduction <add>, %161, %cst_68 [1] : vector<16x32xf32> to vector<16xf32>
    %163 = vector.shape_cast %162 : vector<16xf32> to vector<16x1xf32>
    %cst_69 = arith.constant 3.200000e+01 : f32
    %164 = vector.broadcast %cst_69 : f32 to vector<16x1xf32>
    %165 = arith.divf %163, %164 : vector<16x1xf32>
    %166 = vector.broadcast %158 : vector<16x1xf32> to vector<16x32xf32>
    %167 = arith.subf %154, %166 : vector<16x32xf32>
    %cst_70 = arith.constant 9.99999974E-6 : f32
    %168 = vector.broadcast %cst_70 : f32 to vector<16x1xf32>
    %169 = arith.addf %165, %168 : vector<16x1xf32>
    %170 = math.rsqrt %169 : vector<16x1xf32>
    %171 = vector.broadcast %170 : vector<16x1xf32> to vector<16x32xf32>
    %172 = arith.mulf %167, %171 : vector<16x32xf32>
    %c0_71 = arith.constant 0 : index
    %c0_72 = arith.constant 0 : index
    %c0_73 = arith.constant 0 : index
    %173 = vector.load %arg13[%c0_71, %c0_72, %c0_73] : memref<2x1x32xf32, #tpu.memory_space<vmem>>, vector<1x1x32xf32>
    %174 = vector.shape_cast %173 : vector<1x1x32xf32> to vector<1x32xf32>
    %175 = vector.broadcast %174 : vector<1x32xf32> to vector<16x32xf32>
    %176 = arith.mulf %172, %175 : vector<16x32xf32>
    %c0_74 = arith.constant 0 : index
    %c0_75 = arith.constant 0 : index
    %c0_76 = arith.constant 0 : index
    %177 = vector.load %arg14[%c0_74, %c0_75, %c0_76] : memref<2x1x32xf32, #tpu.memory_space<vmem>>, vector<1x1x32xf32>
    %178 = vector.shape_cast %177 : vector<1x1x32xf32> to vector<1x32xf32>
    %179 = vector.broadcast %178 : vector<1x32xf32> to vector<16x32xf32>
    %180 = arith.addf %176, %179 : vector<16x32xf32>
    %c1 = arith.constant 1 : index
    %c0_77 = arith.constant 0 : index
    %c0_78 = arith.constant 0 : index
    %181 = vector.load %arg3[%c1, %c0_77, %c0_78] : memref<2x32x96xf32, #tpu.memory_space<vmem>>, vector<1x32x96xf32>
    %182 = vector.shape_cast %181 : vector<1x32x96xf32> to vector<32x96xf32>
    %cst_79 = arith.constant dense<0.000000e+00> : vector<16x96xf32>
    %183 = tpu.matmul %180, %182, %cst_79 {dimension_numbers = #tpu.dot_dimension_numbers<[1], [0], [0], [1], [0, 0, 1, 1], [], []>} : vector<16x32xf32>, vector<32x96xf32>, vector<16x96xf32> -> vector<16x96xf32>
    %c1_80 = arith.constant 1 : index
    %c0_81 = arith.constant 0 : index
    %c0_82 = arith.constant 0 : index
    %184 = vector.load %arg4[%c1_80, %c0_81, %c0_82] : memref<2x1x96xf32, #tpu.memory_space<vmem>>, vector<1x1x96xf32>
    %185 = vector.shape_cast %184 : vector<1x1x96xf32> to vector<1x96xf32>
    %186 = vector.broadcast %185 : vector<1x96xf32> to vector<16x96xf32>
    %187 = arith.addf %183, %186 : vector<16x96xf32>
    %188 = vector.extract_strided_slice %187 {offsets = [0, 0], sizes = [16, 8], strides = [1, 1]} : vector<16x96xf32> to vector<16x8xf32>
    %189 = vector.shape_cast %188 : vector<16x8xf32> to vector<2x8x8xf32>
    %190 = vector.extract_strided_slice %187 {offsets = [0, 32], sizes = [16, 8], strides = [1, 1]} : vector<16x96xf32> to vector<16x8xf32>
    %191 = vector.shape_cast %190 : vector<16x8xf32> to vector<2x8x8xf32>
    %192 = vector.extract_strided_slice %187 {offsets = [0, 64], sizes = [16, 8], strides = [1, 1]} : vector<16x96xf32> to vector<16x8xf32>
    %193 = vector.shape_cast %192 : vector<16x8xf32> to vector<2x8x8xf32>
    "tpu.trace_start"() <{level = 10 : i32, message = "bqd,bkd->bqk"}> : () -> ()
    %cst_83 = arith.constant dense<0.000000e+00> : vector<2x8x8xf32>
    %194 = tpu.matmul %189, %191, %cst_83 {dimension_numbers = #tpu.dot_dimension_numbers<[2], [2], [1], [1], [0, 0, 0, 1, 1, 1], [0], [0]>} : vector<2x8x8xf32>, vector<2x8x8xf32>, vector<2x8x8xf32> -> vector<2x8x8xf32>
    "tpu.trace_stop"() : () -> ()
    %cst_84 = arith.constant 0.353553385 : f32
    %195 = vector.broadcast %cst_84 : f32 to vector<2x8x8xf32>
    %196 = arith.mulf %194, %195 : vector<2x8x8xf32>
    %cst_85 = arith.constant dense<0xFF800000> : vector<2x8xf32>
    %197 = vector.multi_reduction <maximumf>, %196, %cst_85 [2] : vector<2x8x8xf32> to vector<2x8xf32>
    %198 = vector.shape_cast %197 : vector<2x8xf32> to vector<2x8x1xf32>
    %199 = vector.broadcast %198 : vector<2x8x1xf32> to vector<2x8x8xf32>
    %200 = arith.subf %196, %199 : vector<2x8x8xf32>
    %201 = math.exp %200 : vector<2x8x8xf32>
    %cst_86 = arith.constant dense<0.000000e+00> : vector<2x8xf32>
    %202 = vector.multi_reduction <add>, %201, %cst_86 [2] : vector<2x8x8xf32> to vector<2x8xf32>
    %203 = vector.shape_cast %202 : vector<2x8xf32> to vector<2x8x1xf32>
    %204 = tpu.reciprocal %203 {approx = true} : vector<2x8x1xf32> -> vector<2x8x1xf32>
    %205 = vector.broadcast %204 : vector<2x8x1xf32> to vector<2x8x8xf32>
    %206 = arith.mulf %201, %205 : vector<2x8x8xf32>
    "tpu.trace_start"() <{level = 10 : i32, message = "bqk,bkd->bqd"}> : () -> ()
    %cst_87 = arith.constant dense<0.000000e+00> : vector<2x8x8xf32>
    %207 = tpu.matmul %206, %193, %cst_87 {dimension_numbers = #tpu.dot_dimension_numbers<[2], [1], [1], [2], [0, 0, 0, 1, 1, 2], [0], [0]>} : vector<2x8x8xf32>, vector<2x8x8xf32>, vector<2x8x8xf32> -> vector<2x8x8xf32>
    "tpu.trace_stop"() : () -> ()
    %208 = vector.shape_cast %207 : vector<2x8x8xf32> to vector<16x8xf32>
    %209 = vector.extract_strided_slice %187 {offsets = [0, 8], sizes = [16, 8], strides = [1, 1]} : vector<16x96xf32> to vector<16x8xf32>
    %210 = vector.shape_cast %209 : vector<16x8xf32> to vector<2x8x8xf32>
    %211 = vector.extract_strided_slice %187 {offsets = [0, 40], sizes = [16, 8], strides = [1, 1]} : vector<16x96xf32> to vector<16x8xf32>
    %212 = vector.shape_cast %211 : vector<16x8xf32> to vector<2x8x8xf32>
    %213 = vector.extract_strided_slice %187 {offsets = [0, 72], sizes = [16, 8], strides = [1, 1]} : vector<16x96xf32> to vector<16x8xf32>
    %214 = vector.shape_cast %213 : vector<16x8xf32> to vector<2x8x8xf32>
    "tpu.trace_start"() <{level = 10 : i32, message = "bqd,bkd->bqk"}> : () -> ()
    %cst_88 = arith.constant dense<0.000000e+00> : vector<2x8x8xf32>
    %215 = tpu.matmul %210, %212, %cst_88 {dimension_numbers = #tpu.dot_dimension_numbers<[2], [2], [1], [1], [0, 0, 0, 1, 1, 1], [0], [0]>} : vector<2x8x8xf32>, vector<2x8x8xf32>, vector<2x8x8xf32> -> vector<2x8x8xf32>
    "tpu.trace_stop"() : () -> ()
    %cst_89 = arith.constant 0.353553385 : f32
    %216 = vector.broadcast %cst_89 : f32 to vector<2x8x8xf32>
    %217 = arith.mulf %215, %216 : vector<2x8x8xf32>
    %cst_90 = arith.constant dense<0xFF800000> : vector<2x8xf32>
    %218 = vector.multi_reduction <maximumf>, %217, %cst_90 [2] : vector<2x8x8xf32> to vector<2x8xf32>
    %219 = vector.shape_cast %218 : vector<2x8xf32> to vector<2x8x1xf32>
    %220 = vector.broadcast %219 : vector<2x8x1xf32> to vector<2x8x8xf32>
    %221 = arith.subf %217, %220 : vector<2x8x8xf32>
    %222 = math.exp %221 : vector<2x8x8xf32>
    %cst_91 = arith.constant dense<0.000000e+00> : vector<2x8xf32>
    %223 = vector.multi_reduction <add>, %222, %cst_91 [2] : vector<2x8x8xf32> to vector<2x8xf32>
    %224 = vector.shape_cast %223 : vector<2x8xf32> to vector<2x8x1xf32>
    %225 = tpu.reciprocal %224 {approx = true} : vector<2x8x1xf32> -> vector<2x8x1xf32>
    %226 = vector.broadcast %225 : vector<2x8x1xf32> to vector<2x8x8xf32>
    %227 = arith.mulf %222, %226 : vector<2x8x8xf32>
    "tpu.trace_start"() <{level = 10 : i32, message = "bqk,bkd->bqd"}> : () -> ()
    %cst_92 = arith.constant dense<0.000000e+00> : vector<2x8x8xf32>
    %228 = tpu.matmul %227, %214, %cst_92 {dimension_numbers = #tpu.dot_dimension_numbers<[2], [1], [1], [2], [0, 0, 0, 1, 1, 2], [0], [0]>} : vector<2x8x8xf32>, vector<2x8x8xf32>, vector<2x8x8xf32> -> vector<2x8x8xf32>
    "tpu.trace_stop"() : () -> ()
    %229 = vector.shape_cast %228 : vector<2x8x8xf32> to vector<16x8xf32>
    %230 = vector.extract_strided_slice %187 {offsets = [0, 16], sizes = [16, 8], strides = [1, 1]} : vector<16x96xf32> to vector<16x8xf32>
    %231 = vector.shape_cast %230 : vector<16x8xf32> to vector<2x8x8xf32>
    %232 = vector.extract_strided_slice %187 {offsets = [0, 48], sizes = [16, 8], strides = [1, 1]} : vector<16x96xf32> to vector<16x8xf32>
    %233 = vector.shape_cast %232 : vector<16x8xf32> to vector<2x8x8xf32>
    %234 = vector.extract_strided_slice %187 {offsets = [0, 80], sizes = [16, 8], strides = [1, 1]} : vector<16x96xf32> to vector<16x8xf32>
    %235 = vector.shape_cast %234 : vector<16x8xf32> to vector<2x8x8xf32>
    "tpu.trace_start"() <{level = 10 : i32, message = "bqd,bkd->bqk"}> : () -> ()
    %cst_93 = arith.constant dense<0.000000e+00> : vector<2x8x8xf32>
    %236 = tpu.matmul %231, %233, %cst_93 {dimension_numbers = #tpu.dot_dimension_numbers<[2], [2], [1], [1], [0, 0, 0, 1, 1, 1], [0], [0]>} : vector<2x8x8xf32>, vector<2x8x8xf32>, vector<2x8x8xf32> -> vector<2x8x8xf32>
    "tpu.trace_stop"() : () -> ()
    %cst_94 = arith.constant 0.353553385 : f32
    %237 = vector.broadcast %cst_94 : f32 to vector<2x8x8xf32>
    %238 = arith.mulf %236, %237 : vector<2x8x8xf32>
    %cst_95 = arith.constant dense<0xFF800000> : vector<2x8xf32>
    %239 = vector.multi_reduction <maximumf>, %238, %cst_95 [2] : vector<2x8x8xf32> to vector<2x8xf32>
    %240 = vector.shape_cast %239 : vector<2x8xf32> to vector<2x8x1xf32>
    %241 = vector.broadcast %240 : vector<2x8x1xf32> to vector<2x8x8xf32>
    %242 = arith.subf %238, %241 : vector<2x8x8xf32>
    %243 = math.exp %242 : vector<2x8x8xf32>
    %cst_96 = arith.constant dense<0.000000e+00> : vector<2x8xf32>
    %244 = vector.multi_reduction <add>, %243, %cst_96 [2] : vector<2x8x8xf32> to vector<2x8xf32>
    %245 = vector.shape_cast %244 : vector<2x8xf32> to vector<2x8x1xf32>
    %246 = tpu.reciprocal %245 {approx = true} : vector<2x8x1xf32> -> vector<2x8x1xf32>
    %247 = vector.broadcast %246 : vector<2x8x1xf32> to vector<2x8x8xf32>
    %248 = arith.mulf %243, %247 : vector<2x8x8xf32>
    "tpu.trace_start"() <{level = 10 : i32, message = "bqk,bkd->bqd"}> : () -> ()
    %cst_97 = arith.constant dense<0.000000e+00> : vector<2x8x8xf32>
    %249 = tpu.matmul %248, %235, %cst_97 {dimension_numbers = #tpu.dot_dimension_numbers<[2], [1], [1], [2], [0, 0, 0, 1, 1, 2], [0], [0]>} : vector<2x8x8xf32>, vector<2x8x8xf32>, vector<2x8x8xf32> -> vector<2x8x8xf32>
    "tpu.trace_stop"() : () -> ()
    %250 = vector.shape_cast %249 : vector<2x8x8xf32> to vector<16x8xf32>
    %251 = vector.extract_strided_slice %187 {offsets = [0, 24], sizes = [16, 8], strides = [1, 1]} : vector<16x96xf32> to vector<16x8xf32>
    %252 = vector.shape_cast %251 : vector<16x8xf32> to vector<2x8x8xf32>
    %253 = vector.extract_strided_slice %187 {offsets = [0, 56], sizes = [16, 8], strides = [1, 1]} : vector<16x96xf32> to vector<16x8xf32>
    %254 = vector.shape_cast %253 : vector<16x8xf32> to vector<2x8x8xf32>
    %255 = vector.extract_strided_slice %187 {offsets = [0, 88], sizes = [16, 8], strides = [1, 1]} : vector<16x96xf32> to vector<16x8xf32>
    %256 = vector.shape_cast %255 : vector<16x8xf32> to vector<2x8x8xf32>
    "tpu.trace_start"() <{level = 10 : i32, message = "bqd,bkd->bqk"}> : () -> ()
    %cst_98 = arith.constant dense<0.000000e+00> : vector<2x8x8xf32>
    %257 = tpu.matmul %252, %254, %cst_98 {dimension_numbers = #tpu.dot_dimension_numbers<[2], [2], [1], [1], [0, 0, 0, 1, 1, 1], [0], [0]>} : vector<2x8x8xf32>, vector<2x8x8xf32>, vector<2x8x8xf32> -> vector<2x8x8xf32>
    "tpu.trace_stop"() : () -> ()
    %cst_99 = arith.constant 0.353553385 : f32
    %258 = vector.broadcast %cst_99 : f32 to vector<2x8x8xf32>
    %259 = arith.mulf %257, %258 : vector<2x8x8xf32>
    %cst_100 = arith.constant dense<0xFF800000> : vector<2x8xf32>
    %260 = vector.multi_reduction <maximumf>, %259, %cst_100 [2] : vector<2x8x8xf32> to vector<2x8xf32>
    %261 = vector.shape_cast %260 : vector<2x8xf32> to vector<2x8x1xf32>
    %262 = vector.broadcast %261 : vector<2x8x1xf32> to vector<2x8x8xf32>
    %263 = arith.subf %259, %262 : vector<2x8x8xf32>
    %264 = math.exp %263 : vector<2x8x8xf32>
    %cst_101 = arith.constant dense<0.000000e+00> : vector<2x8xf32>
    %265 = vector.multi_reduction <add>, %264, %cst_101 [2] : vector<2x8x8xf32> to vector<2x8xf32>
    %266 = vector.shape_cast %265 : vector<2x8xf32> to vector<2x8x1xf32>
    %267 = tpu.reciprocal %266 {approx = true} : vector<2x8x1xf32> -> vector<2x8x1xf32>
    %268 = vector.broadcast %267 : vector<2x8x1xf32> to vector<2x8x8xf32>
    %269 = arith.mulf %264, %268 : vector<2x8x8xf32>
    "tpu.trace_start"() <{level = 10 : i32, message = "bqk,bkd->bqd"}> : () -> ()
    %cst_102 = arith.constant dense<0.000000e+00> : vector<2x8x8xf32>
    %270 = tpu.matmul %269, %256, %cst_102 {dimension_numbers = #tpu.dot_dimension_numbers<[2], [1], [1], [2], [0, 0, 0, 1, 1, 2], [0], [0]>} : vector<2x8x8xf32>, vector<2x8x8xf32>, vector<2x8x8xf32> -> vector<2x8x8xf32>
    "tpu.trace_stop"() : () -> ()
    %271 = vector.shape_cast %270 : vector<2x8x8xf32> to vector<16x8xf32>
    %272 = tpu.concatenate %208, %229, %250, %271 in 1 : vector<16x8xf32>, vector<16x8xf32>, vector<16x8xf32>, vector<16x8xf32> -> vector<16x32xf32>
    %c1_103 = arith.constant 1 : index
    %c0_104 = arith.constant 0 : index
    %c0_105 = arith.constant 0 : index
    %273 = vector.load %arg5[%c1_103, %c0_104, %c0_105] : memref<2x32x32xf32, #tpu.memory_space<vmem>>, vector<1x32x32xf32>
    %274 = vector.shape_cast %273 : vector<1x32x32xf32> to vector<32x32xf32>
    %cst_106 = arith.constant dense<0.000000e+00> : vector<16x32xf32>
    %275 = tpu.matmul %272, %274, %cst_106 {dimension_numbers = #tpu.dot_dimension_numbers<[1], [0], [0], [1], [0, 0, 1, 1], [], []>} : vector<16x32xf32>, vector<32x32xf32>, vector<16x32xf32> -> vector<16x32xf32>
    %c1_107 = arith.constant 1 : index
    %c0_108 = arith.constant 0 : index
    %c0_109 = arith.constant 0 : index
    %276 = vector.load %arg6[%c1_107, %c0_108, %c0_109] : memref<2x1x32xf32, #tpu.memory_space<vmem>>, vector<1x1x32xf32>
    %277 = vector.shape_cast %276 : vector<1x1x32xf32> to vector<1x32xf32>
    %278 = vector.broadcast %277 : vector<1x32xf32> to vector<16x32xf32>
    %279 = arith.addf %275, %278 : vector<16x32xf32>
    %280 = arith.addf %180, %279 : vector<16x32xf32>
    %cst_110 = arith.constant dense<0.000000e+00> : vector<16xf32>
    %281 = vector.multi_reduction <add>, %280, %cst_110 [1] : vector<16x32xf32> to vector<16xf32>
    %282 = vector.shape_cast %281 : vector<16xf32> to vector<16x1xf32>
    %cst_111 = arith.constant 3.200000e+01 : f32
    %283 = vector.broadcast %cst_111 : f32 to vector<16x1xf32>
    %284 = arith.divf %282, %283 : vector<16x1xf32>
    %285 = vector.broadcast %284 : vector<16x1xf32> to vector<16x32xf32>
    %286 = arith.subf %280, %285 : vector<16x32xf32>
    %287 = arith.mulf %286, %286 : vector<16x32xf32>
    %cst_112 = arith.constant dense<0.000000e+00> : vector<16xf32>
    %288 = vector.multi_reduction <add>, %287, %cst_112 [1] : vector<16x32xf32> to vector<16xf32>
    %289 = vector.shape_cast %288 : vector<16xf32> to vector<16x1xf32>
    %cst_113 = arith.constant 3.200000e+01 : f32
    %290 = vector.broadcast %cst_113 : f32 to vector<16x1xf32>
    %291 = arith.divf %289, %290 : vector<16x1xf32>
    %292 = vector.broadcast %284 : vector<16x1xf32> to vector<16x32xf32>
    %293 = arith.subf %280, %292 : vector<16x32xf32>
    %cst_114 = arith.constant 9.99999974E-6 : f32
    %294 = vector.broadcast %cst_114 : f32 to vector<16x1xf32>
    %295 = arith.addf %291, %294 : vector<16x1xf32>
    %296 = math.rsqrt %295 : vector<16x1xf32>
    %297 = vector.broadcast %296 : vector<16x1xf32> to vector<16x32xf32>
    %298 = arith.mulf %293, %297 : vector<16x32xf32>
    %c1_115 = arith.constant 1 : index
    %c0_116 = arith.constant 0 : index
    %c0_117 = arith.constant 0 : index
    %299 = vector.load %arg7[%c1_115, %c0_116, %c0_117] : memref<2x1x32xf32, #tpu.memory_space<vmem>>, vector<1x1x32xf32>
    %300 = vector.shape_cast %299 : vector<1x1x32xf32> to vector<1x32xf32>
    %301 = vector.broadcast %300 : vector<1x32xf32> to vector<16x32xf32>
    %302 = arith.mulf %298, %301 : vector<16x32xf32>
    %c1_118 = arith.constant 1 : index
    %c0_119 = arith.constant 0 : index
    %c0_120 = arith.constant 0 : index
    %303 = vector.load %arg8[%c1_118, %c0_119, %c0_120] : memref<2x1x32xf32, #tpu.memory_space<vmem>>, vector<1x1x32xf32>
    %304 = vector.shape_cast %303 : vector<1x1x32xf32> to vector<1x32xf32>
    %305 = vector.broadcast %304 : vector<1x32xf32> to vector<16x32xf32>
    %306 = arith.addf %302, %305 : vector<16x32xf32>
    %c1_121 = arith.constant 1 : index
    %c0_122 = arith.constant 0 : index
    %c0_123 = arith.constant 0 : index
    %307 = vector.load %arg9[%c1_121, %c0_122, %c0_123] : memref<2x32x64xf32, #tpu.memory_space<vmem>>, vector<1x32x64xf32>
    %308 = vector.shape_cast %307 : vector<1x32x64xf32> to vector<32x64xf32>
    %cst_124 = arith.constant dense<0.000000e+00> : vector<16x64xf32>
    %309 = tpu.matmul %306, %308, %cst_124 {dimension_numbers = #tpu.dot_dimension_numbers<[1], [0], [0], [1], [0, 0, 1, 1], [], []>} : vector<16x32xf32>, vector<32x64xf32>, vector<16x64xf32> -> vector<16x64xf32>
    %c1_125 = arith.constant 1 : index
    %c0_126 = arith.constant 0 : index
    %c0_127 = arith.constant 0 : index
    %310 = vector.load %arg10[%c1_125, %c0_126, %c0_127] : memref<2x1x64xf32, #tpu.memory_space<vmem>>, vector<1x1x64xf32>
    %311 = vector.shape_cast %310 : vector<1x1x64xf32> to vector<1x64xf32>
    %312 = vector.broadcast %311 : vector<1x64xf32> to vector<16x64xf32>
    %313 = arith.addf %309, %312 : vector<16x64xf32>
    %cst_128 = arith.constant 0.000000e+00 : f32
    %314 = vector.broadcast %cst_128 : f32 to vector<16x64xf32>
    %315 = arith.maximumf %313, %314 : vector<16x64xf32>
    %c1_129 = arith.constant 1 : index
    %c0_130 = arith.constant 0 : index
    %c0_131 = arith.constant 0 : index
    %316 = vector.load %arg11[%c1_129, %c0_130, %c0_131] : memref<2x64x32xf32, #tpu.memory_space<vmem>>, vector<1x64x32xf32>
    %317 = vector.shape_cast %316 : vector<1x64x32xf32> to vector<64x32xf32>
    %cst_132 = arith.constant dense<0.000000e+00> : vector<16x32xf32>
    %318 = tpu.matmul %315, %317, %cst_132 {dimension_numbers = #tpu.dot_dimension_numbers<[1], [0], [0], [1], [0, 0, 1, 1], [], []>} : vector<16x64xf32>, vector<64x32xf32>, vector<16x32xf32> -> vector<16x32xf32>
    %c1_133 = arith.constant 1 : index
    %c0_134 = arith.constant 0 : index
    %c0_135 = arith.constant 0 : index
    %319 = vector.load %arg12[%c1_133, %c0_134, %c0_135] : memref<2x1x32xf32, #tpu.memory_space<vmem>>, vector<1x1x32xf32>
    %320 = vector.shape_cast %319 : vector<1x1x32xf32> to vector<1x32xf32>
    %321 = vector.broadcast %320 : vector<1x32xf32> to vector<16x32xf32>
    %322 = arith.addf %318, %321 : vector<16x32xf32>
    %323 = arith.addf %306, %322 : vector<16x32xf32>
    %cst_136 = arith.constant dense<0.000000e+00> : vector<16xf32>
    %324 = vector.multi_reduction <add>, %323, %cst_136 [1] : vector<16x32xf32> to vector<16xf32>
    %325 = vector.shape_cast %324 : vector<16xf32> to vector<16x1xf32>
    %cst_137 = arith.constant 3.200000e+01 : f32
    %326 = vector.broadcast %cst_137 : f32 to vector<16x1xf32>
    %327 = arith.divf %325, %326 : vector<16x1xf32>
    %328 = vector.broadcast %327 : vector<16x1xf32> to vector<16x32xf32>
    %329 = arith.subf %323, %328 : vector<16x32xf32>
    %330 = arith.mulf %329, %329 : vector<16x32xf32>
    %cst_138 = arith.constant dense<0.000000e+00> : vector<16xf32>
    %331 = vector.multi_reduction <add>, %330, %cst_138 [1] : vector<16x32xf32> to vector<16xf32>
    %332 = vector.shape_cast %331 : vector<16xf32> to vector<16x1xf32>
    %cst_139 = arith.constant 3.200000e+01 : f32
    %333 = vector.broadcast %cst_139 : f32 to vector<16x1xf32>
    %334 = arith.divf %332, %333 : vector<16x1xf32>
    %335 = vector.broadcast %327 : vector<16x1xf32> to vector<16x32xf32>
    %336 = arith.subf %323, %335 : vector<16x32xf32>
    %cst_140 = arith.constant 9.99999974E-6 : f32
    %337 = vector.broadcast %cst_140 : f32 to vector<16x1xf32>
    %338 = arith.addf %334, %337 : vector<16x1xf32>
    %339 = math.rsqrt %338 : vector<16x1xf32>
    %340 = vector.broadcast %339 : vector<16x1xf32> to vector<16x32xf32>
    %341 = arith.mulf %336, %340 : vector<16x32xf32>
    %c1_141 = arith.constant 1 : index
    %c0_142 = arith.constant 0 : index
    %c0_143 = arith.constant 0 : index
    %342 = vector.load %arg13[%c1_141, %c0_142, %c0_143] : memref<2x1x32xf32, #tpu.memory_space<vmem>>, vector<1x1x32xf32>
    %343 = vector.shape_cast %342 : vector<1x1x32xf32> to vector<1x32xf32>
    %344 = vector.broadcast %343 : vector<1x32xf32> to vector<16x32xf32>
    %345 = arith.mulf %341, %344 : vector<16x32xf32>
    %c1_144 = arith.constant 1 : index
    %c0_145 = arith.constant 0 : index
    %c0_146 = arith.constant 0 : index
    %346 = vector.load %arg14[%c1_144, %c0_145, %c0_146] : memref<2x1x32xf32, #tpu.memory_space<vmem>>, vector<1x1x32xf32>
    %347 = vector.shape_cast %346 : vector<1x1x32xf32> to vector<1x32xf32>
    %348 = vector.broadcast %347 : vector<1x32xf32> to vector<16x32xf32>
    %349 = arith.addf %345, %348 : vector<16x32xf32>
    %350 = tpu.iota {dimensions = array<i32: 1>} : vector<2x16xi32>
    %351 = tpu.iota {dimensions = array<i32: 0>} : vector<2x16xi32>
    %c8_i32 = arith.constant 8 : i32
    %352 = vector.broadcast %c8_i32 : i32 to vector<2x16xi32>
    %353 = arith.muli %351, %352 : vector<2x16xi32>
    %354 = arith.cmpi sge, %350, %353 : vector<2x16xi32>
    %c1_i32 = arith.constant 1 : i32
    %355 = vector.broadcast %c1_i32 : i32 to vector<2x16xi32>
    %356 = arith.addi %351, %355 : vector<2x16xi32>
    %c8_i32_147 = arith.constant 8 : i32
    %357 = vector.broadcast %c8_i32_147 : i32 to vector<2x16xi32>
    %358 = arith.muli %356, %357 : vector<2x16xi32>
    %359 = arith.cmpi slt, %350, %358 : vector<2x16xi32>
    %360 = arith.andi %354, %359 : vector<2x16xi1>
    %361 = arith.extui %360 : vector<2x16xi1> to vector<2x16xi32>
    %362 = arith.sitofp %361 : vector<2x16xi32> to vector<2x16xf32>
    %cst_148 = arith.constant 1.250000e-01 : f32
    %363 = vector.broadcast %cst_148 : f32 to vector<2x16xf32>
    %364 = arith.mulf %362, %363 : vector<2x16xf32>
    %cst_149 = arith.constant dense<0.000000e+00> : vector<2x32xf32>
    %365 = tpu.matmul %364, %349, %cst_149 {dimension_numbers = #tpu.dot_dimension_numbers<[1], [0], [0], [1], [0, 0, 1, 1], [], []>} : vector<2x16xf32>, vector<16x32xf32>, vector<2x32xf32> -> vector<2x32xf32>
    %c0_150 = arith.constant 0 : index
    %c0_151 = arith.constant 0 : index
    %366 = vector.load %arg15[%c0_150, %c0_151] : memref<32x10xf32, #tpu.memory_space<vmem>>, vector<32x10xf32>
    %cst_152 = arith.constant dense<0.000000e+00> : vector<2x10xf32>
    %367 = tpu.matmul %365, %366, %cst_152 {dimension_numbers = #tpu.dot_dimension_numbers<[1], [0], [0], [1], [0, 0, 1, 1], [], []>} : vector<2x32xf32>, vector<32x10xf32>, vector<2x10xf32> -> vector<2x10xf32>
    %c0_153 = arith.constant 0 : index
    %c0_154 = arith.constant 0 : index
    %368 = vector.load %arg16[%c0_153, %c0_154] : memref<1x10xf32, #tpu.memory_space<vmem>>, vector<1x10xf32>
    %369 = vector.broadcast %368 : vector<1x10xf32> to vector<2x10xf32>
    %370 = arith.addf %367, %369 : vector<2x10xf32>
    %cst_155 = arith.constant 0.000000e+00 : f32
    %371 = vector.broadcast %cst_155 : f32 to vector<2x10xf32>
    %372 = arith.maximumf %370, %371 : vector<2x10xf32>
    %c0_156 = arith.constant 0 : index
    %c0_157 = arith.constant 0 : index
    %373 = vector.load %arg17[%c0_156, %c0_157] : memref<10x2xf32, #tpu.memory_space<vmem>>, vector<10x2xf32>
    %cst_158 = arith.constant dense<0.000000e+00> : vector<2x2xf32>
    %374 = tpu.matmul %372, %373, %cst_158 {dimension_numbers = #tpu.dot_dimension_numbers<[1], [0], [0], [1], [0, 0, 1, 1], [], []>} : vector<2x10xf32>, vector<10x2xf32>, vector<2x2xf32> -> vector<2x2xf32>
    %c0_159 = arith.constant 0 : index
    %c0_160 = arith.constant 0 : index
    %375 = vector.load %arg18[%c0_159, %c0_160] : memref<1x2xf32, #tpu.memory_space<vmem>>, vector<1x2xf32>
    %376 = vector.broadcast %375 : vector<1x2xf32> to vector<2x2xf32>
    %377 = arith.addf %374, %376 : vector<2x2xf32>
    %c0_161 = arith.constant 0 : index
    %c0_162 = arith.constant 0 : index
    %378 = vector.load %arg19[%c0_161, %c0_162] : memref<2x2xf32, #tpu.memory_space<vmem>>, vector<2x2xf32>
    tpu.vector_store %arg19[%c0_161, %c0_162], %377 {strides = array<i32>} : memref<2x2xf32, #tpu.memory_space<vmem>>, vector<2x2xf32>,
    return
  }
}

</mosaic_0001>

<bundles_post_ra>
// kernel: forward.1
= control target key start
LH: loop header
LB: loop body
LE: loop exit
PB: predicated region body
PF: predicated region fallthrough
CT: control target
= control target key end

     0   :  { %s5658_s0 = inlined_call_operand.vmem [shape: s32[16,1], index: 0, kind: input, shape index: {}]   ;;  %s5659_s1 = inlined_call_operand.vmem [shape: f32[50,32], index: 1, kind: input, shape index: {}]   ;;  %s5660_s2 = inlined_call_operand.vmem [shape: f32[16,32], index: 2, kind: input, shape index: {}]   ;;  %s5661_s3 = inlined_call_operand.vmem [shape: f32[2,32,96], index: 3, kind: input, shape index: {}]   ;;  %s5662_s4 = inlined_call_operand.vmem [shape: f32[2,1,96], index: 4, kind: input, shape index: {}]   ;;  %s5663_s5 = inlined_call_operand.vmem [shape: f32[2,32,32], index: 5, kind: input, shape index: {}]   ;;  %s5664_s6 = inlined_call_operand.vmem [shape: f32[2,1,32], index: 6, kind: input, shape index: {}]   ;;  %s5665_s7 = inlined_call_operand.vmem [shape: f32[2,1,32], index: 7, kind: input, shape index: {}]   ;;  %s5666_s8 = inlined_call_operand.vmem [shape: f32[2,1,32], index: 8, kind: input, shape index: {}]   ;;  %s5667_s9 = inlined_call_operand.vmem [shape: f32[2,32,64], index: 9, kind: input, shape index: {}]   ;;  %s5668_s10 = inlined_call_operand.vmem [shape: f32[2,1,64], index: 10, kind: input, shape index: {}]   ;;  %s5669_s11 = inlined_call_operand.vmem [shape: f32[2,64,32], index: 11, kind: input, shape index: {}]   ;;  %s5670_s12 = inlined_call_operand.vmem [shape: f32[2,1,32], index: 12, kind: input, shape index: {}]   ;;  %s5671_s13 = inlined_call_operand.vmem [shape: f32[2,1,32], index: 13, kind: input, shape index: {}]   ;;  %s5672_s14 = inlined_call_operand.vmem [shape: f32[2,1,32], index: 14, kind: input, shape index: {}]   ;;  %s5673_s15 = inlined_call_operand.vmem [shape: f32[32,10], index: 15, kind: input, shape index: {}]   ;;  %s5674_s16 = inlined_call_operand.vmem [shape: f32[1,10], index: 16, kind: input, shape index: {}]   ;;  %s5675_s17 = inlined_call_operand.vmem [shape: f32[10,2], index: 17, kind: input, shape index: {}]   ;;  %s5676_s18 = inlined_call_operand.vmem [shape: f32[1,2], index: 18, kind: input, shape index: {}]   ;;  %s5677_s19 = inlined_call_operand.hbm [shape: f32[2,2], index: 19, kind: output, shape index: {}]  }
   0x1   :  { %5701 = sst [smem:[#allocation5_spill]] %s5658_s0 }
   0x2   :  { %5702 = sst [smem:[#allocation6_spill]] %s5659_s1 }
   0x3   :  { %5703 = sst [smem:[#allocation7_spill]] %s5660_s2 }
   0x4   :  { %5704 = sst [smem:[#allocation8_spill]] %s5661_s3 }
   0x5   :  { %5705 = sst [smem:[#allocation9_spill]] %s5672_s14 }
   0x6   :  { %s5706_s20 = sld [smem:[#allocation5_spill]]  ;;  %s5707_s14 = sld [smem:[#allocation6_spill]]  ;;  %v4907_v2 = vmov 0  }
   0x7   :  { %4802 = vset.pattern.permute.xlu0 %v4907_v2 }
   0xc   :  { %v63_v0 = vld [vmem:[%s5706_s20] sm:$0xff]  ;;  %v80_v3 = vld [vmem:[%s5707_s14 + $0x8] sm:$0xff]  ;;  %v81_v4 = vld [vmem:[%s5707_s14 + $0x10] sm:$0xff] }
   0xd   :  { %v79_v1 = vld [vmem:[%s5707_s14] sm:$0xff]  ;;  %v82_v5 = vld [vmem:[%s5707_s14 + $0x18] sm:$0xff]  ;;  %68 = vperm.xlu0 %4802, %v63_v0  }
   0xe   :  { %v4677_v6 = vpack.c.bf16 %v80_v3, %v79_v1  ;;  %v4681_v7 = vpack.c.bf16 %v82_v5, %v81_v4 }
   0xf   :  { %24 = vsyncpa [#allocation3], 0  ;;  %v64_v8 = vld [vmem:[%s5706_s20 + $0x8] sm:$0xff]  ;;  %v83_v9 = vld [vmem:[%s5707_s14 + $0x20] sm:$0xff]  ;;  %s5708_s22 = sld [smem:[#allocation8_spill]]  ;;  %vm93_vm0 = vcmask 1041408   ;;  %v65_v17 = vlaneseq }
  0x10   :  { %v84_v10 = vld [vmem:[%s5707_s14 + $0x28] sm:$0xff]  ;;  %4678 = vmatprep.subr.bf16.mxu0 %v4677_v6  ;;  %v85_v15 = vld [vmem:[%s5707_s14 + $0x30] sm:$0x3]  ;;  %v4908_v16 = vmov 0.0   ;;  %vm86_vm1 = vcmask 408576   ;;  %s5709_s29 = sld [smem:[#allocation7_spill]] }
  0x11   :  { %4680 = vmatpush3.bf16.msra.mxu0 %v4677_v6  ;;  %71 = vperm.xlu0 %4802, %v64_v8   ;;  %v4685_v11 = vpack.c.bf16 %v84_v10, %v83_v9  ;;  %v5064_v18 = vand.u32 127, %v65_v17  ;;  %vm189_vm4 = vcmask 261120   ;;  %vm4909_vm5 = vmmov 0   ;;  %v4116_v34 = vld [vmem:[%s5662_s4] ss:$0 sm:$0xff]  ;;  %s4910_s2 = smov 96  }
  0x12   :  { %4682 = vmatprep.subr.bf16.mxu0 %v4681_v7  ;;  %vm274_vm6 = vcmask 64512   ;;  %s4911_s23 = smov 64   ;;  %s4912_s20 = smov 88   ;;  %vm1627_vm7 = vcmask 195584   ;;  %vm1624_vm8 = vcmask 130048   ;;  %vm1878_vm9 = vcmask 523264  }
  0x13   :  { %s4913_s24 = smov 120   ;;  %s4914_s14 = smov 56   ;;  %vm4925_vm13 = vmmov 1   ;;  %vm4018_vm15 = vcmask 80896  }
  0x14   :  { %s5699_s25 = smov 80   ;;  %s5697_s3 = smov 112   ;;  %vm4780_vm14 = vmpackc.low %vm93_vm0, %vm4925_vm13 }
  0x15   :  { %v178_v12 = vld [vmem:[%s5708_s22] sm:$0xff]  ;;  %v179_v13 = vld [vmem:[%s5708_s22 + $0x8] sm:$0xff]  ;;  %4684 = vmatpush3.bf16.msra.mxu0 %v4681_v7  ;;  %v180_v23 = vld [vmem:[%s5708_s22 + $0x10] sm:$0xff]  ;;  %s5693_s26 = smov 48   ;;  %s5691_s27 = smov 72  }
  0x16   :  { %v4689_v14 = vpack.c.bf16 %v179_v13, %v178_v12  ;;  %4686 = vmatprep.subr.bf16.mxu0 %v4685_v11  ;;  %v181_v24 = vld [vmem:[%s5708_s22 + $0x18] sm:$0xff]  ;;  %v174_v29 = vld [vmem:[%s5709_s29] sm:$0xff]  ;;  %v175_v30 = vld [vmem:[%s5709_s29 + $0x8] sm:$0xff]  ;;  %s5689_s28 = smov 104   ;;  %s5687_s29 = smov 40  }
  0x17   :  { %v4693_v25 = vpack.c.bf16 %v181_v24, %v180_v23  ;;  %s5683_s0 = smov 8   ;;  %s5685_s30 = smov 16  }
  0x18   :  { %4690 = vmatprep.subr.bf16.mxu1 %v4689_v14  ;;  %s5695_s21 = smov 24  }
  0x19   :  { %4692 = vmatpush3.bf16.msra.mxu1 %v4689_v14  ;;  %4688 = vmatpush3.bf16.msra.mxu0 %v4685_v11 }
  0x1a   :  { %4383 = vmatprep.subr.msk.mxu0 %vm93_vm0, %v85_v15  ;;  %4694 = vmatprep.subr.bf16.mxu1 %v4693_v25 }
  0x1d   :  { %4384 = vmatpush3.msk.msra.mxu0 %vm93_vm0, %v85_v15  ;;  %4696 = vmatpush3.bf16.msra.mxu1 %v4693_v25 }
  0x1e   :  { %4409 = vmatprep.subr.mxu0 %v4908_v16  ;;  %4399 = vmatprep.subr.mxu1 %v4908_v16 }
  0x8c   :  { %v69_v19 = vpop.permute.xlu0 %68 }
  0x8d   :  { %vm73_vm2 = vcmp.eq.s32.totalorder %v5064_v18, %v69_v19 }
  0x8e   :  { %v4111_v20 = vsel %vm73_vm2, 1.0, %v4908_v16 }
  0x8f   :  { %4385 = vmatprep.mubr.msk.f32.mxu0 %vm86_vm1, %v4111_v20 }
  0x90   :  { %v72_v21 = vpop.permute.xlu0 %71 }
  0x91   :  { %vm74_vm3 = vcmp.eq.s32.totalorder %v5064_v18, %v72_v21 }
  0x92   :  { %v4112_v22 = vsel %vm74_vm3, 1.0, %v4908_v16 }
  0x93   :  { %4386 = vmatmul.mubr.msk.f32.vlgmr.msra.gmra.mrb[0].mxu0 %vm86_vm1, %v4112_v22  ;;  %vm4095_vm1 = vcmask 9216  }
  0x94   :  { %4411 = vmatprep.mubr.msk.f32.mxu0 %vm4909_vm5, %v4908_v16 }
 0x166   :  { %v4387_v26 = vpop.f32.mrb[0].mxu0 }
 0x167   :  { %v173_v27 = vmul.f32 5.656854, %v4387_v26  ;;  %v163_v28 = vpop.f32.mrb[1].mxu0 }
 0x168   :  { %v172_v31 = vmul.f32 5.656854, %v163_v28 }
 0x169   :  { %v5085_v33 = vadd.f32 %v175_v30, %v173_v27 }
 0x16a   :  { %v5083_v32 = vadd.f32 %v174_v29, %v172_v31 }
 0x16c   :  { %4396 = vmatprep.mubr.msk.f32.mxu1 %vm189_vm4, %v5083_v32 }
 0x16d   :  { %4397 = vmatmul.mubr.msk.f32.vlgmr.msra.gmra.mrb[0].mxu1 %vm189_vm4, %v5085_v33 }
 0x16e   :  { %4401 = vmatprep.mubr.msk.f32.mxu1 %vm4909_vm5, %v4908_v16 }
 0x240   :  { %v4398_v35 = vpop.f32.mrb[0].mxu1 }
 0x241   :  { %v262_v36 = vpop.f32.mrb[1].mxu1  ;;  %v5102_v38 = vadd.f32 %v4398_v35, %v4116_v34 }
 0x242   :  { %v5098_v37 = vadd.f32 %v4116_v34, %v262_v36 }
 0x244   :  { %272 = vrot.lane.b32.xlu1 %v5098_v37, %s4910_s2 }
 0x248   :  { %350 = vrot.lane.b32.xlu1 %v5102_v38, %s4910_s2 }
 0x2b6   :  { %v273_v39 = vpop.permute.xlu1 %272 }
 0x2b7   :  { %4400 = vmatpush3.xpose.msk.msra.mxu1 %vm274_vm6, %v273_v39 }
 0x2b8   :  { %4404 = vmatprep.subr.mxu1 %v4908_v16 }
 0x2ba   :  { %4402 = vmatmul.mubr.msk.f32.vlgmr.msra.gmra.mrb[2].mxu1 %vm274_vm6, %v5098_v37  ;;  %v351_v40 = vpop.permute.xlu1 %350 }
 0x2bb   :  { %4405 = vmatpush3.xpose.msk.msra.mxu1 %vm274_vm6, %v351_v40  ;;  %4406 = vmatprep.mubr.msk.f32.mxu1 %vm4909_vm5, %v4908_v16 }
 0x2bc   :  { %4414 = vmatprep.subr.mxu1 %v4908_v16 }
 0x2be   :  { %4407 = vmatmul.mubr.msk.f32.vlgmr.msra.gmra.mrb[4].mxu1 %vm274_vm6, %v5102_v38 }
 0x2bf   :  { %4416 = vmatprep.mubr.msk.f32.mxu1 %vm4909_vm5, %v4908_v16 }
 0x38d   :  { %v345_v41 = vpop.f32.mrb[2].mxu1 }
 0x38e   :  { %v426_v42 = vmul.f32 0.35355338, %v345_v41  ;;  %v4403_v43 = vpop.f32.mrb[3].mxu1 }
 0x390   :  { %v428_v44 = vsel %vm274_vm6, %v426_v42, -inf }
 0x391   :  { %429 = vmax.xlane.f32.xlu0 %v428_v44  ;;  %v422_v45 = vpop.f32.mrb[4].mxu1 }
 0x392   :  { %v427_v46 = vmul.f32 0.35355338, %v422_v45  ;;  %v4408_v47 = vpop.f32.mrb[5].mxu1 }
 0x394   :  { %v431_v48 = vsel %vm274_vm6, %v427_v46, -inf }
 0x395   :  { %432 = vmax.xlane.f32.xlu1 %v431_v48 }
 0x3a6   :  { %450 = vrot.lane.b32.xlu1 %v5098_v37, %s4911_s23 }
 0x3a7   :  { %526 = vrot.lane.b32.xlu0 %v5102_v38, %s4911_s23 }
 0x3aa   :  { %604 = vrot.lane.b32.xlu1 %v5098_v37, %s4912_s20 }
 0x3ae   :  { %682 = vrot.lane.b32.xlu1 %v5102_v38, %s4912_s20 }
 0x3b2   :  { %680 = vrot.lane.b32.xlu1 %v5102_v38, %s4913_s24 }
 0x41e   :  { %v430_v49 = vpop.xlane.xlu0 %429 }
 0x41f   :  { %v434_v50 = vsub.f32 %v426_v42, %v430_v49 }
 0x421   :  { %v436_v51 = vmul.f32 1.442695, %v434_v50 }
 0x422   :  { %v527_v52 = vpop.permute.xlu0 %526  ;;  %v433_v53 = vpop.xlane.xlu1 %432 }
 0x423   :  { %4803 = vpow2.f32 %v436_v51  ;;  %v435_v54 = vsub.f32 %v427_v46, %v433_v53  ;;  %4415 = vmatpush3.msra.mxu1 %v527_v52 }
 0x424   :  { %4424 = vmatprep.subr.mxu1 %v4908_v16 }
 0x425   :  { %v438_v55 = vmul.f32 1.442695, %v435_v54 }
 0x426   :  { %v451_v56 = vpop.permute.xlu1 %450 }
 0x427   :  { %4805 = vpow2.f32 %v438_v55  ;;  %4410 = vmatpush3.msra.mxu0 %v451_v56 }
 0x428   :  { %4419 = vmatprep.subr.mxu0 %v4908_v16 }
 0x42a   :  { %v605_v63 = vpop.permute.xlu1 %604 }
 0x42d   :  { %v4804_v57 = vpop.eup %4803 }
 0x42e   :  { %v440_v58 = vsel %vm274_vm6, %v4804_v57, 0.0  ;;  %v683_v3 = vpop.permute.xlu1 %682 }
 0x42f   :  { %441 = vadd.xlane.f32.xlu0 %v440_v58 }
 0x431   :  { %v4806_v59 = vpop.eup %4805 }
 0x432   :  { %v443_v60 = vsel %vm274_vm6, %v4806_v59, 0.0  ;;  %v681_v6 = vpop.permute.xlu1 %680 }
 0x433   :  { %444 = vadd.xlane.f32.xlu0 %v443_v60 }
 0x449   :  { %602 = vrot.lane.b32.xlu0 %v5098_v37, %s4913_s24 }
 0x4bc   :  { %v442_v61 = vpop.xlane.xlu0 %441 }
 0x4bd   :  { %4807 = vrcp.f32 %v442_v61 }
 0x4c0   :  { %v445_v62 = vpop.xlane.xlu0 %444 }
 0x4c1   :  { %4809 = vrcp.f32 %v445_v62 }
 0x4c4   :  { %v603_v5 = vpop.permute.xlu0 %602 }
 0x4c7   :  { %v4808_v0 = vpop.eup %4807 }
 0x4c8   :  { %v448_v1 = vmul.f32 %v4808_v0, %v4804_v57 }
 0x4ca   :  { %4412 = vmatmul.mubr.msk.f32.vlgmr.msra.gmra.mrb[2].mxu0 %vm274_vm6, %v448_v1 }
 0x4cb   :  { %v4810_v2 = vpop.eup %4809  ;;  %4420 = vmatpush3.xpose.msk.msra.mxu0 %vm274_vm6, %v605_v63  ;;  %4421 = vmatprep.mubr.msk.f32.mxu0 %vm4909_vm5, %v4908_v16 }
 0x4cc   :  { %v449_v4 = vmul.f32 %v4810_v2, %v4806_v59  ;;  %4429 = vmatprep.subr.mxu0 %v4908_v16 }
 0x4ce   :  { %4417 = vmatmul.mubr.msk.f32.vlgmr.msra.gmra.mrb[6].mxu1 %vm274_vm6, %v449_v4  ;;  %4422 = vmatmul.mubr.msk.f32.vlgmr.msra.gmra.mrb[4].mxu0 %vm274_vm6, %v603_v5 }
 0x4cf   :  { %4425 = vmatpush3.xpose.msk.msra.mxu1 %vm274_vm6, %v683_v3  ;;  %4426 = vmatprep.mubr.msk.f32.mxu1 %vm4909_vm5, %v4908_v16 }
 0x4d0   :  { %4434 = vmatprep.subr.mxu1 %v4908_v16  ;;  %4431 = vmatprep.mubr.msk.f32.mxu0 %vm4909_vm5, %v4908_v16 }
 0x4d2   :  { %4427 = vmatmul.mubr.msk.f32.vlgmr.msra.gmra.mrb[8].mxu1 %vm274_vm6, %v681_v6 }
 0x4d3   :  { %4436 = vmatprep.mubr.msk.f32.mxu1 %vm4909_vm5, %v4908_v16 }
 0x59d   :  { %v5152_v7 = vpop.f32.mrb[2].mxu0 }
 0x59e   :  { %v4413_v8 = vpop.f32.mrb[3].mxu0 }
 0x5a1   :  { %v5154_v9 = vpop.f32.mrb[6].mxu1  ;;  %v676_v10 = vpop.f32.mrb[4].mxu0 }
 0x5a2   :  { %v758_v11 = vmul.f32 0.35355338, %v676_v10  ;;  %v4418_v12 = vpop.f32.mrb[7].mxu1  ;;  %v4423_v13 = vpop.f32.mrb[5].mxu0 }
 0x5a4   :  { %v760_v14 = vsel %vm274_vm6, %v758_v11, -inf }
 0x5a5   :  { %761 = vmax.xlane.f32.xlu0 %v760_v14  ;;  %v754_v15 = vpop.f32.mrb[8].mxu1 }
 0x5a6   :  { %v759_v19 = vmul.f32 0.35355338, %v754_v15  ;;  %v4428_v20 = vpop.f32.mrb[9].mxu1 }
 0x5a8   :  { %v763_v21 = vsel %vm274_vm6, %v759_v19, -inf }
 0x5a9   :  { %764 = vmax.xlane.f32.xlu1 %v763_v21 }
 0x5ba   :  { %782 = vrot.lane.b32.xlu1 %v5098_v37, %s4914_s14 }
 0x5bb   :  { %858 = vrot.lane.b32.xlu0 %v5102_v38, %s4914_s14 }
 0x5be   :  { %936 = vrot.lane.b32.xlu1 %v5098_v37, %s5699_s25 }
 0x5c2   :  { %1014 = vrot.lane.b32.xlu1 %v5102_v38, %s5699_s25 }
 0x5c6   :  { %1012 = vrot.lane.b32.xlu1 %v5102_v38, %s5697_s3 }
 0x632   :  { %v762_v22 = vpop.xlane.xlu0 %761 }
 0x633   :  { %v766_v23 = vsub.f32 %v758_v11, %v762_v22 }
 0x635   :  { %v768_v24 = vmul.f32 1.442695, %v766_v23 }
 0x636   :  { %v859_v25 = vpop.permute.xlu0 %858  ;;  %v765_v26 = vpop.xlane.xlu1 %764 }
 0x637   :  { %4811 = vpow2.f32 %v768_v24  ;;  %v767_v27 = vsub.f32 %v759_v19, %v765_v26  ;;  %4435 = vmatpush3.msra.mxu1 %v859_v25 }
 0x638   :  { %4444 = vmatprep.subr.mxu1 %v4908_v16 }
 0x639   :  { %v770_v28 = vmul.f32 1.442695, %v767_v27 }
 0x63a   :  { %v783_v29 = vpop.permute.xlu1 %782 }
 0x63b   :  { %4813 = vpow2.f32 %v770_v28  ;;  %4430 = vmatpush3.msra.mxu0 %v783_v29 }
 0x63c   :  { %4439 = vmatprep.subr.mxu0 %v4908_v16 }
 0x63e   :  { %v937_v40 = vpop.permute.xlu1 %936 }
 0x641   :  { %v4812_v30 = vpop.eup %4811 }
 0x642   :  { %v772_v31 = vsel %vm274_vm6, %v4812_v30, 0.0  ;;  %v1015_v44 = vpop.permute.xlu1 %1014 }
 0x643   :  { %773 = vadd.xlane.f32.xlu0 %v772_v31 }
 0x645   :  { %v4814_v34 = vpop.eup %4813 }
 0x646   :  { %v775_v35 = vsel %vm274_vm6, %v4814_v34, 0.0  ;;  %v1013_v47 = vpop.permute.xlu1 %1012 }
 0x647   :  { %776 = vadd.xlane.f32.xlu0 %v775_v35 }
 0x65d   :  { %934 = vrot.lane.b32.xlu0 %v5098_v37, %s5697_s3 }
 0x6d0   :  { %v774_v36 = vpop.xlane.xlu0 %773 }
 0x6d1   :  { %4815 = vrcp.f32 %v774_v36 }
 0x6d4   :  { %v777_v39 = vpop.xlane.xlu0 %776 }
 0x6d5   :  { %4817 = vrcp.f32 %v777_v39 }
 0x6d8   :  { %v935_v46 = vpop.permute.xlu0 %934 }
 0x6db   :  { %v4816_v41 = vpop.eup %4815 }
 0x6dc   :  { %v780_v42 = vmul.f32 %v4816_v41, %v4812_v30 }
 0x6de   :  { %4432 = vmatmul.mubr.msk.f32.vlgmr.msra.gmra.mrb[6].mxu0 %vm274_vm6, %v780_v42 }
 0x6df   :  { %v4818_v43 = vpop.eup %4817  ;;  %4440 = vmatpush3.xpose.msk.msra.mxu0 %vm274_vm6, %v937_v40  ;;  %4441 = vmatprep.mubr.msk.f32.mxu0 %vm4909_vm5, %v4908_v16 }
 0x6e0   :  { %v781_v45 = vmul.f32 %v4818_v43, %v4814_v34  ;;  %4449 = vmatprep.subr.mxu0 %v4908_v16 }
 0x6e2   :  { %4437 = vmatmul.mubr.msk.f32.vlgmr.msra.gmra.mrb[10].mxu1 %vm274_vm6, %v781_v45  ;;  %4442 = vmatmul.mubr.msk.f32.vlgmr.msra.gmra.mrb[8].mxu0 %vm274_vm6, %v935_v46 }
 0x6e3   :  { %4445 = vmatpush3.xpose.msk.msra.mxu1 %vm274_vm6, %v1015_v44  ;;  %4446 = vmatprep.mubr.msk.f32.mxu1 %vm4909_vm5, %v4908_v16 }
 0x6e4   :  { %4454 = vmatprep.subr.mxu1 %v4908_v16  ;;  %4451 = vmatprep.mubr.msk.f32.mxu0 %vm4909_vm5, %v4908_v16 }
 0x6e6   :  { %4447 = vmatmul.mubr.msk.f32.vlgmr.msra.gmra.mrb[12].mxu1 %vm274_vm6, %v1013_v47 }
 0x6e7   :  { %4456 = vmatprep.mubr.msk.f32.mxu1 %vm4909_vm5, %v4908_v16 }
 0x7b1   :  { %v5190_v48 = vpop.f32.mrb[6].mxu0 }
 0x7b2   :  { %v4433_v49 = vpop.f32.mrb[7].mxu0 }
 0x7b5   :  { %v5192_v50 = vpop.f32.mrb[10].mxu1  ;;  %v1008_v51 = vpop.f32.mrb[8].mxu0 }
 0x7b6   :  { %v1090_v52 = vmul.f32 0.35355338, %v1008_v51  ;;  %v4438_v53 = vpop.f32.mrb[11].mxu1  ;;  %v4443_v54 = vpop.f32.mrb[9].mxu0 }
 0x7b8   :  { %v1092_v55 = vsel %vm274_vm6, %v1090_v52, -inf }
 0x7b9   :  { %1093 = vmax.xlane.f32.xlu0 %v1092_v55  ;;  %v1086_v56 = vpop.f32.mrb[12].mxu1 }
 0x7ba   :  { %v1091_v57 = vmul.f32 0.35355338, %v1086_v56  ;;  %v4448_v58 = vpop.f32.mrb[13].mxu1  ;;  %v1631_v56 = vld [vmem:[%s5663_s5 + $0x8] sm:$0xff] }
 0x7bb   :  { %v1632_v58 = vld [vmem:[%s5663_s5 + $0x10] sm:$0xff] }
 0x7bc   :  { %v1095_v59 = vsel %vm274_vm6, %v1091_v57, -inf }
 0x7bd   :  { %1096 = vmax.xlane.f32.xlu1 %v1095_v59  ;;  %v1633_v59 = vld [vmem:[%s5663_s5 + $0x18] sm:$0xff] }
 0x7ce   :  { %1114 = vrot.lane.b32.xlu1 %v5098_v37, %s5693_s26 }
 0x7cf   :  { %1190 = vrot.lane.b32.xlu0 %v5102_v38, %s5693_s26 }
 0x7d2   :  { %1268 = vrot.lane.b32.xlu1 %v5098_v37, %s5691_s27 }
 0x7d6   :  { %1346 = vrot.lane.b32.xlu1 %v5102_v38, %s5691_s27  ;;  %s5718_s27 = smov 16  }
 0x7da   :  { %1344 = vrot.lane.b32.xlu1 %v5102_v38, %s5689_s28 }
 0x846   :  { %v1094_v60 = vpop.xlane.xlu0 %1093 }
 0x847   :  { %v1098_v61 = vsub.f32 %v1090_v52, %v1094_v60  ;;  %v4701_v60 = vpack.c.bf16 %v1633_v59, %v1632_v58  ;;  %v4147_v59 = vld [vmem:[%s5666_s8] ss:$0 sm:$0xff] }
 0x849   :  { %v1100_v62 = vmul.f32 1.442695, %v1098_v61 }
 0x84a   :  { %v1191_v63 = vpop.permute.xlu0 %1190  ;;  %v1097_v0 = vpop.xlane.xlu1 %1096 }
 0x84b   :  { %4819 = vpow2.f32 %v1100_v62  ;;  %v1099_v1 = vsub.f32 %v1091_v57, %v1097_v0  ;;  %4455 = vmatpush3.msra.mxu1 %v1191_v63 }
 0x84c   :  { %4464 = vmatprep.subr.mxu1 %v4908_v16 }
 0x84d   :  { %v1102_v2 = vmul.f32 1.442695, %v1099_v1 }
 0x84e   :  { %v1115_v3 = vpop.permute.xlu1 %1114 }
 0x84f   :  { %4821 = vpow2.f32 %v1102_v2  ;;  %4450 = vmatpush3.msra.mxu0 %v1115_v3 }
 0x850   :  { %4459 = vmatprep.subr.mxu0 %v4908_v16 }
 0x852   :  { %v1269_v12 = vpop.permute.xlu1 %1268 }
 0x855   :  { %v4820_v4 = vpop.eup %4819 }
 0x856   :  { %v1104_v5 = vsel %vm274_vm6, %v4820_v4, 0.0  ;;  %v1347_v19 = vpop.permute.xlu1 %1346 }
 0x857   :  { %1105 = vadd.xlane.f32.xlu0 %v1104_v5 }
 0x859   :  { %v4822_v6 = vpop.eup %4821 }
 0x85a   :  { %v1107_v8 = vsel %vm274_vm6, %v4822_v6, 0.0  ;;  %v1345_v22 = vpop.permute.xlu1 %1344 }
 0x85b   :  { %1108 = vadd.xlane.f32.xlu0 %v1107_v8 }
 0x871   :  { %1266 = vrot.lane.b32.xlu0 %v5098_v37, %s5689_s28 }
 0x8e4   :  { %v1106_v10 = vpop.xlane.xlu0 %1105 }
 0x8e5   :  { %4823 = vrcp.f32 %v1106_v10 }
 0x8e8   :  { %v1109_v11 = vpop.xlane.xlu0 %1108 }
 0x8e9   :  { %4825 = vrcp.f32 %v1109_v11 }
 0x8ec   :  { %v1267_v21 = vpop.permute.xlu0 %1266 }
 0x8ef   :  { %v4824_v13 = vpop.eup %4823 }
 0x8f0   :  { %v1112_v14 = vmul.f32 %v4824_v13, %v4820_v4 }
 0x8f2   :  { %4452 = vmatmul.mubr.msk.f32.vlgmr.msra.gmra.mrb[10].mxu0 %vm274_vm6, %v1112_v14 }
 0x8f3   :  { %v4826_v15 = vpop.eup %4825  ;;  %4460 = vmatpush3.xpose.msk.msra.mxu0 %vm274_vm6, %v1269_v12  ;;  %4461 = vmatprep.mubr.msk.f32.mxu0 %vm4909_vm5, %v4908_v16 }
 0x8f4   :  { %v1113_v20 = vmul.f32 %v4826_v15, %v4822_v6  ;;  %4469 = vmatprep.subr.mxu0 %v4908_v16 }
 0x8f6   :  { %4457 = vmatmul.mubr.msk.f32.vlgmr.msra.gmra.mrb[14].mxu1 %vm274_vm6, %v1113_v20  ;;  %4462 = vmatmul.mubr.msk.f32.vlgmr.msra.gmra.mrb[12].mxu0 %vm274_vm6, %v1267_v21 }
 0x8f7   :  { %4465 = vmatpush3.xpose.msk.msra.mxu1 %vm274_vm6, %v1347_v19  ;;  %4466 = vmatprep.mubr.msk.f32.mxu1 %vm4909_vm5, %v4908_v16 }
 0x8f8   :  { %4474 = vmatprep.subr.mxu1 %v4908_v16  ;;  %4471 = vmatprep.mubr.msk.f32.mxu0 %vm4909_vm5, %v4908_v16 }
 0x8fa   :  { %4467 = vmatmul.mubr.msk.f32.vlgmr.msra.gmra.mrb[16].mxu1 %vm274_vm6, %v1345_v22 }
 0x8fb   :  { %4476 = vmatprep.mubr.msk.f32.mxu1 %vm4909_vm5, %v4908_v16 }
 0x9c5   :  { %v1186_v23 = vpop.f32.mrb[10].mxu0 }
 0x9c6   :  { %v4453_v24 = vpop.f32.mrb[11].mxu0 }
 0x9c9   :  { %v1262_v25 = vpop.f32.mrb[14].mxu1  ;;  %v1340_v26 = vpop.f32.mrb[12].mxu0 }
 0x9ca   :  { %v1422_v27 = vmul.f32 0.35355338, %v1340_v26  ;;  %v4458_v28 = vpop.f32.mrb[15].mxu1  ;;  %v4463_v29 = vpop.f32.mrb[13].mxu0 }
 0x9cc   :  { %v1424_v30 = vsel %vm274_vm6, %v1422_v27, -inf }
 0x9cd   :  { %1425 = vmax.xlane.f32.xlu0 %v1424_v30  ;;  %v1418_v31 = vpop.f32.mrb[16].mxu1 }
 0x9ce   :  { %v1423_v34 = vmul.f32 0.35355338, %v1418_v31  ;;  %v4468_v35 = vpop.f32.mrb[17].mxu1 }
 0x9d0   :  { %v1427_v36 = vsel %vm274_vm6, %v1423_v34, -inf }
 0x9d1   :  { %1428 = vmax.xlane.f32.xlu1 %v1427_v36  ;;  %v1770_v36 = vld [vmem:[%s5667_s9 + $0x8] sm:$0xff] }
 0x9e2   :  { %1446 = vrot.lane.b32.xlu1 %v5098_v37, %s5687_s29 }
 0x9e6   :  { %1600 = vrot.lane.b32.xlu1 %v5190_v48, %s5683_s0 }
 0x9ea   :  { %1602 = vrot.lane.b32.xlu1 %v5192_v50, %s5683_s0 }
 0x9ee   :  { %1610 = vrot.lane.b32.xlu1 %v1262_v25, %s5685_s30 }
 0xa5a   :  { %v1426_v39 = vpop.xlane.xlu0 %1425 }
 0xa5b   :  { %v1430_v40 = vsub.f32 %v1422_v27, %v1426_v39 }
 0xa5d   :  { %v1432_v41 = vmul.f32 1.442695, %v1430_v40  ;;  %v1771_v40 = vld [vmem:[%s5667_s9 + $0x10] sm:$0xff] }
 0xa5e   :  { %v1429_v42 = vpop.xlane.xlu1 %1428 }
 0xa5f   :  { %4827 = vpow2.f32 %v1432_v41  ;;  %v1431_v43 = vsub.f32 %v1423_v34, %v1429_v42  ;;  %v1772_v41 = vld [vmem:[%s5667_s9 + $0x18] sm:$0xff] }
 0xa60   :  { %v4709_v42 = vpack.c.bf16 %v1772_v41, %v1771_v40  ;;  %v4159_v40 = vld [vmem:[%s5708_s22 + $0x38] sm:$0xff] }
 0xa61   :  { %v1434_v44 = vmul.f32 1.442695, %v1431_v43  ;;  %v1863_v43 = vld [vmem:[%s5669_s11] sm:$0xff] }
 0xa62   :  { %v1447_v45 = vpop.permute.xlu1 %1446 }
 0xa63   :  { %4829 = vpow2.f32 %v1434_v44  ;;  %4470 = vmatpush3.msra.mxu0 %v1447_v45  ;;  %v1864_v44 = vld [vmem:[%s5669_s11 + $0x8] sm:$0xff]  ;;  %v1865_v45 = vld [vmem:[%s5669_s11 + $0x10] sm:$0xff] }
 0xa66   :  { %v1601_v1 = vpop.permute.xlu1 %1600 }
 0xa67   :  { %v1622_v4 = vsel %vm274_vm6, %v5152_v7, %v1601_v1  ;;  %v4143_v7 = vld [vmem:[%s5664_s6] ss:$0 sm:$0xff] }
 0xa69   :  { %v4828_v37 = vpop.eup %4827 }
 0xa6a   :  { %v1436_v46 = vsel %vm274_vm6, %v4828_v37, 0.0  ;;  %v1603_v2 = vpop.permute.xlu1 %1602 }
 0xa6b   :  { %1437 = vadd.xlane.f32.xlu0 %v1436_v46  ;;  %v1623_v11 = vsel %vm274_vm6, %v5154_v9, %v1603_v2  ;;  %v1866_v46 = vld [vmem:[%s5669_s11 + $0x18] sm:$0xff]  ;;  %v1869_v2 = vld [vmem:[%s5669_s11 + $0x30] sm:$0xff] }
 0xa6d   :  { %v4830_v47 = vpop.eup %4829 }
 0xa6e   :  { %v1439_v48 = vsel %vm274_vm6, %v4830_v47, 0.0  ;;  %v1611_v5 = vpop.permute.xlu1 %1610 }
 0xa6f   :  { %1440 = vadd.xlane.f32.xlu0 %v1439_v48  ;;  %v1626_v12 = vsel %vm1624_vm8, %v1623_v11, %v1611_v5  ;;  %v1867_v48 = vld [vmem:[%s5669_s11 + $0x20] sm:$0xff] }
 0xa70   :  { %v4148_v5 = vld [vmem:[%s5668_s10] ss:$0 sm:$0xff] }
 0xa85   :  { %1522 = vrot.lane.b32.xlu0 %v5102_v38, %s5687_s29  ;;  %v1630_v38 = vld [vmem:[%s5663_s5] sm:$0xff] }
 0xa86   :  { %v4697_v57 = vpack.c.bf16 %v1631_v56, %v1630_v38 }
 0xa88   :  { %4698 = vmatprep.subr.bf16.mxu0 %v4697_v57 }
 0xa89   :  { %1608 = vrot.lane.b32.xlu0 %v1186_v23, %s5685_s30  ;;  %s5710_s30 = sld [smem:[#allocation9_spill]] }
 0xaf8   :  { %v1438_v49 = vpop.xlane.xlu0 %1437 }
 0xaf9   :  { %4831 = vrcp.f32 %v1438_v49  ;;  %v1868_v49 = vld [vmem:[%s5669_s11 + $0x28] sm:$0xff] }
 0xafc   :  { %v1441_v50 = vpop.xlane.xlu0 %1440 }
 0xafd   :  { %4833 = vrcp.f32 %v1441_v50  ;;  %v4721_v50 = vpack.c.bf16 %v1868_v49, %v1867_v48  ;;  %v4154_v48 = vld [vmem:[%s5671_s13] ss:$0 sm:$0xff] }
 0xb00   :  { %v1523_v51 = vpop.permute.xlu0 %1522 }
 0xb01   :  { %4475 = vmatpush3.msra.mxu1 %v1523_v51 }
 0xb03   :  { %v4832_v52 = vpop.eup %4831 }
 0xb04   :  { %v1444_v53 = vmul.f32 %v4832_v52, %v4828_v37  ;;  %v1609_v3 = vpop.permute.xlu0 %1608  ;;  %v4713_v37 = vpack.c.bf16 %v1864_v44, %v1863_v43 }
 0xb05   :  { %v1625_v6 = vsel %vm1624_vm8, %v1622_v4, %v1609_v3  ;;  %v1870_v3 = vld [vmem:[%s5669_s11 + $0x38] sm:$0xff] }
 0xb06   :  { %4472 = vmatmul.mubr.msk.f32.vlgmr.msra.gmra.mrb[14].mxu0 %vm274_vm6, %v1444_v53  ;;  %v4725_v4 = vpack.c.bf16 %v1870_v3, %v1869_v2 }
 0xb07   :  { %v4834_v54 = vpop.eup %4833  ;;  %4700 = vmatpush3.bf16.msra.mxu0 %v4697_v57  ;;  %v4146_v57 = vld [vmem:[%s5665_s7] ss:$0 sm:$0xff] }
 0xb08   :  { %v1445_v55 = vmul.f32 %v4834_v54, %v4830_v47  ;;  %4702 = vmatprep.subr.bf16.mxu0 %v4701_v60  ;;  %v4717_v47 = vpack.c.bf16 %v1866_v46, %v1865_v45 }
 0xb0a   :  { %4477 = vmatmul.mubr.msk.f32.vlgmr.msra.gmra.mrb[18].mxu1 %vm274_vm6, %v1445_v55 }
 0xb0b   :  { %4704 = vmatpush3.bf16.msra.mxu0 %v4701_v60 }
 0xb0c   :  { %4714 = vmatprep.subr.bf16.mxu0 %v4713_v37 }
 0xbd9   :  { %v1518_v61 = vpop.f32.mrb[14].mxu0 }
 0xbda   :  { %1616 = vrot.lane.b32.xlu0 %v1518_v61, %s5695_s21  ;;  %v4473_v62 = vpop.f32.mrb[15].mxu0 }
 0xbdd   :  { %v1594_v63 = vpop.f32.mrb[18].mxu1 }
 0xbde   :  { %1618 = vrot.lane.b32.xlu1 %v1594_v63, %s5695_s21  ;;  %v4478_v0 = vpop.f32.mrb[19].mxu1  ;;  %s5717_s21 = smov 8  }
 0xc4c   :  { %v1617_v8 = vpop.permute.xlu0 %1616 }
 0xc4d   :  { %v1628_v10 = vsel %vm1627_vm7, %v1625_v6, %v1617_v8 }
 0xc4e   :  { %4487 = vmatprep.mubr.msk.f32.mxu0 %vm189_vm4, %v1628_v10 }
 0xc50   :  { %v1619_v13 = vpop.permute.xlu1 %1618 }
 0xc51   :  { %v1629_v14 = vsel %vm1627_vm7, %v1626_v12, %v1619_v13 }
 0xc52   :  { %4488 = vmatmul.mubr.msk.f32.vlgmr.msra.gmra.mrb[16].mxu0 %vm189_vm4, %v1629_v14  ;;  %v4151_v14 = vld [vmem:[%s5670_s12] ss:$0 sm:$0xff] }
 0xc53   :  { %4716 = vmatpush3.bf16.msra.mxu0 %v4713_v37 }
 0xc54   :  { %4718 = vmatprep.subr.bf16.mxu0 %v4717_v47 }
 0xc57   :  { %4720 = vmatpush3.bf16.msra.mxu0 %v4717_v47 }
 0xc58   :  { %4722 = vmatprep.subr.bf16.mxu0 %v4721_v50 }
 0xc5b   :  { %4724 = vmatpush3.bf16.msra.mxu0 %v4721_v50 }
 0xc5c   :  { %4726 = vmatprep.subr.bf16.mxu0 %v4725_v4 }
 0xc5f   :  { %4728 = vmatpush3.bf16.msra.mxu0 %v4725_v4 }
 0xc60   :  { %4541 = vmatprep.subr.mxu0 %v4908_v16 }
 0xd25   :  { %v4489_v15 = vpop.f32.mrb[16].mxu0 }
 0xd26   :  { %v1719_v19 = vadd.f32 %v4489_v15, %v4143_v7  ;;  %v1713_v20 = vpop.f32.mrb[17].mxu0 }
 0xd27   :  { %v1714_v21 = vadd.f32 %v4143_v7, %v1713_v20 }
 0xd28   :  { %v1723_v22 = vadd.f32 %v1719_v19, %v5085_v33 }
 0xd29   :  { %v1722_v23 = vadd.f32 %v1714_v21, %v5083_v32  ;;  %v1769_v32 = vld [vmem:[%s5667_s9] sm:$0xff] }
 0xd2a   :  { %v1727_v9 = vsel %vm189_vm4, %v1723_v22, 0.0  ;;  %v4705_v39 = vpack.c.bf16 %v1770_v36, %v1769_v32  ;;  %v4157_v32 = vld [vmem:[%s5708_s22 + $0x28] sm:$0xff] }
 0xd2b   :  { %1728 = vadd.xlane.f32.xlu1 %v1727_v9  ;;  %v1724_v24 = vsel %vm189_vm4, %v1722_v23, 0.0 }
 0xd2c   :  { %1725 = vadd.xlane.f32.xlu0 %v1724_v24  ;;  %4706 = vmatprep.subr.bf16.mxu1 %v4705_v39 }
 0xd2d   :  { %4708 = vmatpush3.bf16.msra.mxu1 %v4705_v39  ;;  %v4158_v39 = vld [vmem:[%s5708_s22 + $0x30] sm:$0xff] }
 0xd2e   :  { %4710 = vmatprep.subr.bf16.mxu1 %v4709_v42  ;;  %v4733_v41 = vpack.c.bf16 %v4159_v40, %v4158_v39 }
 0xd31   :  { %4712 = vmatpush3.bf16.msra.mxu1 %v4709_v42 }
 0xdb8   :  { %v1729_v25 = vpop.xlane.xlu1 %1728 }
 0xdb9   :  { %v1732_v26 = vmul.f32 0.03125, %v1729_v25  ;;  %v1726_v27 = vpop.xlane.xlu0 %1725 }
 0xdba   :  { %v1731_v28 = vmul.f32 0.03125, %v1726_v27 }
 0xdbb   :  { %v1734_v29 = vsub.f32 %v1723_v22, %v1732_v26 }
 0xdbc   :  { %v1733_v30 = vsub.f32 %v1722_v23, %v1731_v28 }
 0xdbd   :  { %v1736_v35 = vmul.f32 %v1734_v29, %v1734_v29 }
 0xdbe   :  { %v1735_v31 = vmul.f32 %v1733_v30, %v1733_v30 }
 0xdbf   :  { %v1740_v33 = vsel %vm189_vm4, %v1736_v35, 0.0 }
 0xdc0   :  { %v1737_v34 = vsel %vm189_vm4, %v1735_v31, 0.0 }
 0xdc1   :  { %1738 = vadd.xlane.f32.xlu0 %v1737_v34 }
 0xdc5   :  { %1741 = vadd.xlane.f32.xlu0 %v1740_v33  ;;  %v4156_v33 = vld [vmem:[%s5708_s22 + $0x20] sm:$0xff] }
 0xdc6   :  { %v4729_v36 = vpack.c.bf16 %v4157_v32, %v4156_v33 }
 0xdc8   :  { %4730 = vmatprep.subr.bf16.mxu1 %v4729_v36 }
 0xe4e   :  { %v1739_v51 = vpop.xlane.xlu0 %1738 }
 0xe4f   :  { %v1743_v52 = vmul.f32 0.03125, %v1739_v51 }
 0xe51   :  { %v1745_v53 = vadd.f32 1e-05, %v1743_v52 }
 0xe52   :  { %v1742_v54 = vpop.xlane.xlu0 %1741 }
 0xe53   :  { %4835 = vrsqrt.f32 %v1745_v53  ;;  %v1744_v55 = vmul.f32 0.03125, %v1742_v54  ;;  %v4155_v53 = vld [vmem:[%s5710_s30] ss:$0 sm:$0xff] }
 0xe55   :  { %v1746_v38 = vadd.f32 1e-05, %v1744_v55 }
 0xe57   :  { %4837 = vrsqrt.f32 %v1746_v38 }
 0xe5d   :  { %v4836_v56 = vpop.eup %4835 }
 0xe5e   :  { %v1749_v58 = vmul.f32 %v4836_v56, %v1733_v30  ;;  %v4161_v56 = vld [vmem:[%s5662_s4 + $0x1] ss:$0 sm:$0xff]  ;;  %s5711_s4 = smov 80  }
 0xe60   :  { %v1758_v60 = vmul.f32 %v4146_v57, %v1749_v58 }
 0xe61   :  { %v4838_v61 = vpop.eup %4837 }
 0xe62   :  { %v1750_v62 = vmul.f32 %v4838_v61, %v1734_v29  ;;  %v1767_v63 = vadd.f32 %v4147_v59, %v1758_v60 }
 0xe64   :  { %v1759_v0 = vmul.f32 %v4146_v57, %v1750_v62  ;;  %4498 = vmatprep.mubr.msk.f32.mxu1 %vm189_vm4, %v1767_v63 }
 0xe66   :  { %v1768_v1 = vadd.f32 %v4147_v59, %v1759_v0 }
 0xe68   :  { %4499 = vmatmul.mubr.msk.f32.vlgmr.msra.gmra.mrb[20].mxu1 %vm189_vm4, %v1768_v1 }
 0xe69   :  { %4732 = vmatpush3.bf16.msra.mxu1 %v4729_v36 }
 0xe6a   :  { %4734 = vmatprep.subr.bf16.mxu1 %v4733_v41 }
 0xe6d   :  { %4736 = vmatpush3.bf16.msra.mxu1 %v4733_v41 }
 0xe6e   :  { %4531 = vmatprep.subr.mxu1 %v4908_v16 }
 0xf3b   :  { %v4500_v6 = vpop.f32.mrb[20].mxu1 }
 0xf3c   :  { %v1858_v8 = vadd.f32 %v4500_v6, %v4148_v5  ;;  %v1852_v10 = vpop.f32.mrb[21].mxu1 }
 0xf3d   :  { %v1853_v11 = vadd.f32 %v4148_v5, %v1852_v10 }
 0xf3e   :  { %v1862_v13 = vmax.f32 %v1858_v8, 0.0 }
 0xf3f   :  { %v1861_v12 = vmax.f32 %v1853_v11, 0.0 }
 0xf41   :  { %4517 = vmatprep.mubr.msk.f32.mxu0 %vm1878_vm9, %v1861_v12 }
 0xf42   :  { %4518 = vmatmul.mubr.msk.f32.vlgmr.msra.gmra.mrb[18].mxu0 %vm1878_vm9, %v1862_v13 }
 0xf43   :  { %4543 = vmatprep.mubr.msk.f32.mxu0 %vm4909_vm5, %v4908_v16 }
0x1015   :  { %v4519_v7 = vpop.f32.mrb[18].mxu0 }
0x1016   :  { %v1957_v15 = vadd.f32 %v4519_v7, %v4151_v14  ;;  %v1951_v19 = vpop.f32.mrb[19].mxu0 }
0x1017   :  { %v1952_v20 = vadd.f32 %v4151_v14, %v1951_v19 }
0x1018   :  { %v1961_v21 = vadd.f32 %v1957_v15, %v1768_v1 }
0x1019   :  { %v1960_v22 = vadd.f32 %v1952_v20, %v1767_v63 }
0x101a   :  { %v1965_v23 = vsel %vm189_vm4, %v1961_v21, 0.0 }
0x101b   :  { %1966 = vadd.xlane.f32.xlu0 %v1965_v23  ;;  %v1962_v9 = vsel %vm189_vm4, %v1960_v22, 0.0 }
0x101c   :  { %1963 = vadd.xlane.f32.xlu1 %v1962_v9 }
0x10a8   :  { %v1967_v24 = vpop.xlane.xlu0 %1966 }
0x10a9   :  { %v1969_v25 = vmul.f32 0.03125, %v1967_v24  ;;  %v1964_v26 = vpop.xlane.xlu1 %1963 }
0x10aa   :  { %v1968_v27 = vmul.f32 0.03125, %v1964_v26 }
0x10ab   :  { %v1971_v28 = vsub.f32 %v1961_v21, %v1969_v25 }
0x10ac   :  { %v1970_v29 = vsub.f32 %v1960_v22, %v1968_v27 }
0x10ad   :  { %v1973_v30 = vmul.f32 %v1971_v28, %v1971_v28 }
0x10ae   :  { %v1972_v31 = vmul.f32 %v1970_v29, %v1970_v29 }
0x10af   :  { %v1977_v34 = vsel %vm189_vm4, %v1973_v30, 0.0 }
0x10b0   :  { %1978 = vadd.xlane.f32.xlu0 %v1977_v34  ;;  %v1974_v35 = vsel %vm189_vm4, %v1972_v31, 0.0 }
0x10b1   :  { %1975 = vadd.xlane.f32.xlu1 %v1974_v35 }
0x113d   :  { %v1979_v42 = vpop.xlane.xlu0 %1978 }
0x113e   :  { %v1981_v43 = vmul.f32 0.03125, %v1979_v42  ;;  %v1976_v44 = vpop.xlane.xlu1 %1975 }
0x113f   :  { %v1980_v45 = vmul.f32 0.03125, %v1976_v44 }
0x1140   :  { %v1983_v37 = vadd.f32 1e-05, %v1981_v43 }
0x1141   :  { %v1982_v46 = vadd.f32 1e-05, %v1980_v45 }
0x1142   :  { %4839 = vrsqrt.f32 %v1983_v37 }
0x1143   :  { %4841 = vrsqrt.f32 %v1982_v46 }
0x114c   :  { %v4840_v47 = vpop.eup %4839 }
0x114d   :  { %v4842_v49 = vpop.eup %4841  ;;  %v1987_v50 = vmul.f32 %v4840_v47, %v1971_v28 }
0x114e   :  { %v1986_v51 = vmul.f32 %v4842_v49, %v1970_v29 }
0x114f   :  { %v1996_v52 = vmul.f32 %v4154_v48, %v1987_v50 }
0x1150   :  { %v1995_v54 = vmul.f32 %v4154_v48, %v1986_v51 }
0x1151   :  { %v5357_v38 = vadd.f32 %v4155_v53, %v1996_v52 }
0x1152   :  { %v5355_v55 = vadd.f32 %v4155_v53, %v1995_v54 }
0x1154   :  { %4528 = vmatprep.mubr.msk.f32.mxu1 %vm189_vm4, %v5355_v55 }
0x1155   :  { %4529 = vmatmul.mubr.msk.f32.vlgmr.msra.gmra.mrb[22].mxu1 %vm189_vm4, %v5357_v38 }
0x1156   :  { %4533 = vmatprep.mubr.msk.f32.mxu1 %vm4909_vm5, %v4908_v16 }
0x1228   :  { %v4530_v57 = vpop.f32.mrb[22].mxu1 }
0x1229   :  { %v5368_v58 = vadd.f32 %v4530_v57, %v4161_v56  ;;  %v2091_v59 = vpop.f32.mrb[23].mxu1 }
0x122a   :  { %v5370_v60 = vadd.f32 %v4161_v56, %v2091_v59 }
0x122b   :  { %2178 = vrot.lane.b32.xlu0 %v5368_v58, %s4910_s2 }
0x122c   :  { %2101 = vrot.lane.b32.xlu1 %v5370_v60, %s4910_s2  ;;  %s5712_s2 = smov 112  }
0x129d   :  { %v2179_v62 = vpop.permute.xlu0 %2178 }
0x129e   :  { %v2102_v61 = vpop.permute.xlu1 %2101 }
0x129f   :  { %4532 = vmatpush3.xpose.msk.msra.mxu1 %vm274_vm6, %v2102_v61 }
0x12a0   :  { %4536 = vmatprep.subr.mxu1 %v4908_v16 }
0x12a2   :  { %4534 = vmatmul.mubr.msk.f32.vlgmr.msra.gmra.mrb[24].mxu1 %vm274_vm6, %v5370_v60 }
0x12a3   :  { %4537 = vmatpush3.xpose.msk.msra.mxu1 %vm274_vm6, %v2179_v62  ;;  %4538 = vmatprep.mubr.msk.f32.mxu1 %vm4909_vm5, %v4908_v16 }
0x12a4   :  { %4546 = vmatprep.subr.mxu1 %v4908_v16 }
0x12a6   :  { %4539 = vmatmul.mubr.msk.f32.vlgmr.msra.gmra.mrb[26].mxu1 %vm274_vm6, %v5368_v58 }
0x12a7   :  { %4548 = vmatprep.mubr.msk.f32.mxu1 %vm4909_vm5, %v4908_v16 }
0x1375   :  { %v2173_v63 = vpop.f32.mrb[24].mxu1 }
0x1376   :  { %v2254_v0 = vmul.f32 0.35355338, %v2173_v63  ;;  %v4535_v1 = vpop.f32.mrb[25].mxu1 }
0x1378   :  { %v2256_v2 = vsel %vm274_vm6, %v2254_v0, -inf }
0x1379   :  { %2257 = vmax.xlane.f32.xlu1 %v2256_v2  ;;  %v2250_v3 = vpop.f32.mrb[26].mxu1 }
0x137a   :  { %v2255_v4 = vmul.f32 0.35355338, %v2250_v3  ;;  %v4540_v5 = vpop.f32.mrb[27].mxu1 }
0x137c   :  { %v2259_v6 = vsel %vm274_vm6, %v2255_v4, -inf }
0x137d   :  { %2260 = vmax.xlane.f32.xlu0 %v2259_v6 }
0x138a   :  { %2278 = vrot.lane.b32.xlu1 %v5370_v60, %s4911_s23 }
0x138e   :  { %2432 = vrot.lane.b32.xlu1 %v5370_v60, %s4912_s20 }
0x1392   :  { %2510 = vrot.lane.b32.xlu1 %v5368_v58, %s4912_s20  ;;  %s5714_s20 = smov 72  }
0x1393   :  { %2354 = vrot.lane.b32.xlu0 %v5368_v58, %s4911_s23  ;;  %s5713_s23 = smov 48  }
0x1406   :  { %v2258_v8 = vpop.xlane.xlu1 %2257 }
0x1407   :  { %v2262_v10 = vsub.f32 %v2254_v0, %v2258_v8 }
0x1409   :  { %v2264_v11 = vmul.f32 1.442695, %v2262_v10 }
0x140a   :  { %v2279_v12 = vpop.permute.xlu1 %2278  ;;  %v2261_v13 = vpop.xlane.xlu0 %2260 }
0x140b   :  { %4843 = vpow2.f32 %v2264_v11  ;;  %v2263_v14 = vsub.f32 %v2255_v4, %v2261_v13  ;;  %4542 = vmatpush3.msra.mxu0 %v2279_v12 }
0x140c   :  { %4551 = vmatprep.subr.mxu0 %v4908_v16 }
0x140d   :  { %v2266_v7 = vmul.f32 1.442695, %v2263_v14 }
0x140e   :  { %v2355_v15 = vpop.permute.xlu0 %2354  ;;  %v2433_v23 = vpop.permute.xlu1 %2432 }
0x140f   :  { %4845 = vpow2.f32 %v2266_v7  ;;  %4547 = vmatpush3.msra.mxu1 %v2355_v15 }
0x1410   :  { %4556 = vmatprep.subr.mxu1 %v4908_v16 }
0x1412   :  { %v2511_v9 = vpop.permute.xlu1 %2510 }
0x1415   :  { %v4844_v19 = vpop.eup %4843 }
0x1416   :  { %v2268_v20 = vsel %vm274_vm6, %v4844_v19, 0.0 }
0x1417   :  { %2269 = vadd.xlane.f32.xlu1 %v2268_v20 }
0x1419   :  { %v4846_v21 = vpop.eup %4845 }
0x141a   :  { %v2271_v22 = vsel %vm274_vm6, %v4846_v21, 0.0 }
0x141b   :  { %2272 = vadd.xlane.f32.xlu0 %v2271_v22 }
0x1428   :  { %2508 = vrot.lane.b32.xlu1 %v5368_v58, %s4913_s24 }
0x1431   :  { %2430 = vrot.lane.b32.xlu0 %v5370_v60, %s4913_s24  ;;  %s5715_s24 = smov 104  }
0x14a4   :  { %v2270_v24 = vpop.xlane.xlu1 %2269 }
0x14a5   :  { %4847 = vrcp.f32 %v2270_v24 }
0x14a8   :  { %v2273_v25 = vpop.xlane.xlu0 %2272  ;;  %v2509_v31 = vpop.permute.xlu1 %2508 }
0x14a9   :  { %4849 = vrcp.f32 %v2273_v25 }
0x14ac   :  { %v2431_v30 = vpop.permute.xlu0 %2430 }
0x14af   :  { %v4848_v26 = vpop.eup %4847 }
0x14b0   :  { %v2276_v27 = vmul.f32 %v4848_v26, %v4844_v19 }
0x14b2   :  { %4544 = vmatmul.mubr.msk.f32.vlgmr.msra.gmra.mrb[20].mxu0 %vm274_vm6, %v2276_v27 }
0x14b3   :  { %v4850_v28 = vpop.eup %4849  ;;  %4552 = vmatpush3.xpose.msk.msra.mxu0 %vm274_vm6, %v2433_v23  ;;  %4553 = vmatprep.mubr.msk.f32.mxu0 %vm4909_vm5, %v4908_v16 }
0x14b4   :  { %v2277_v29 = vmul.f32 %v4850_v28, %v4846_v21  ;;  %4561 = vmatprep.subr.mxu0 %v4908_v16 }
0x14b6   :  { %4549 = vmatmul.mubr.msk.f32.vlgmr.msra.gmra.mrb[28].mxu1 %vm274_vm6, %v2277_v29  ;;  %4554 = vmatmul.mubr.msk.f32.vlgmr.msra.gmra.mrb[22].mxu0 %vm274_vm6, %v2431_v30 }
0x14b7   :  { %4557 = vmatpush3.xpose.msk.msra.mxu1 %vm274_vm6, %v2511_v9  ;;  %4558 = vmatprep.mubr.msk.f32.mxu1 %vm4909_vm5, %v4908_v16 }
0x14b8   :  { %4566 = vmatprep.subr.mxu1 %v4908_v16  ;;  %4563 = vmatprep.mubr.msk.f32.mxu0 %vm4909_vm5, %v4908_v16 }
0x14ba   :  { %4559 = vmatmul.mubr.msk.f32.vlgmr.msra.gmra.mrb[30].mxu1 %vm274_vm6, %v2509_v31 }
0x14bb   :  { %4568 = vmatprep.mubr.msk.f32.mxu1 %vm4909_vm5, %v4908_v16 }
0x1585   :  { %v5422_v34 = vpop.f32.mrb[20].mxu0 }
0x1586   :  { %v4545_v35 = vpop.f32.mrb[21].mxu0 }
0x1589   :  { %v5424_v33 = vpop.f32.mrb[28].mxu1  ;;  %v2504_v32 = vpop.f32.mrb[22].mxu0 }
0x158a   :  { %v2586_v36 = vmul.f32 0.35355338, %v2504_v32  ;;  %v4550_v39 = vpop.f32.mrb[29].mxu1  ;;  %v4555_v40 = vpop.f32.mrb[23].mxu0 }
0x158c   :  { %v2588_v41 = vsel %vm274_vm6, %v2586_v36, -inf }
0x158d   :  { %2589 = vmax.xlane.f32.xlu0 %v2588_v41  ;;  %v2582_v42 = vpop.f32.mrb[30].mxu1 }
0x158e   :  { %v2587_v43 = vmul.f32 0.35355338, %v2582_v42  ;;  %v4560_v44 = vpop.f32.mrb[31].mxu1 }
0x1590   :  { %v2591_v45 = vsel %vm274_vm6, %v2587_v43, -inf }
0x1591   :  { %2592 = vmax.xlane.f32.xlu1 %v2591_v45 }
0x15a2   :  { %2610 = vrot.lane.b32.xlu1 %v5370_v60, %s4914_s14 }
0x15a3   :  { %2686 = vrot.lane.b32.xlu0 %v5368_v58, %s4914_s14  ;;  %s5716_s14 = smov 40  }
0x15a6   :  { %2764 = vrot.lane.b32.xlu1 %v5370_v60, %s5711_s4 }
0x15aa   :  { %2842 = vrot.lane.b32.xlu1 %v5368_v58, %s5711_s4  ;;  %s5719_s4 = smov 24  }
0x15ae   :  { %2840 = vrot.lane.b32.xlu1 %v5368_v58, %s5712_s2 }
0x161a   :  { %v2590_v37 = vpop.xlane.xlu0 %2589 }
0x161b   :  { %v2594_v46 = vsub.f32 %v2586_v36, %v2590_v37 }
0x161d   :  { %v2596_v47 = vmul.f32 1.442695, %v2594_v46 }
0x161e   :  { %v2687_v48 = vpop.permute.xlu0 %2686  ;;  %v2593_v49 = vpop.xlane.xlu1 %2592 }
0x161f   :  { %4851 = vpow2.f32 %v2596_v47  ;;  %v2595_v50 = vsub.f32 %v2587_v43, %v2593_v49  ;;  %4567 = vmatpush3.msra.mxu1 %v2687_v48 }
0x1620   :  { %4576 = vmatprep.subr.mxu1 %v4908_v16 }
0x1621   :  { %v2598_v51 = vmul.f32 1.442695, %v2595_v50 }
0x1622   :  { %v2611_v52 = vpop.permute.xlu1 %2610 }
0x1623   :  { %4853 = vpow2.f32 %v2598_v51  ;;  %4562 = vmatpush3.msra.mxu0 %v2611_v52 }
0x1624   :  { %4571 = vmatprep.subr.mxu0 %v4908_v16 }
0x1626   :  { %v2765_v62 = vpop.permute.xlu1 %2764 }
0x1629   :  { %v4852_v53 = vpop.eup %4851 }
0x162a   :  { %v2600_v54 = vsel %vm274_vm6, %v4852_v53, 0.0  ;;  %v2843_v2 = vpop.permute.xlu1 %2842 }
0x162b   :  { %2601 = vadd.xlane.f32.xlu0 %v2600_v54 }
0x162d   :  { %v4854_v56 = vpop.eup %4853 }
0x162e   :  { %v2603_v57 = vsel %vm274_vm6, %v4854_v56, 0.0  ;;  %v2841_v5 = vpop.permute.xlu1 %2840 }
0x162f   :  { %2604 = vadd.xlane.f32.xlu0 %v2603_v57 }
0x1645   :  { %2762 = vrot.lane.b32.xlu0 %v5370_v60, %s5712_s2 }
0x16b8   :  { %v2602_v59 = vpop.xlane.xlu0 %2601 }
0x16b9   :  { %4855 = vrcp.f32 %v2602_v59 }
0x16bc   :  { %v2605_v61 = vpop.xlane.xlu0 %2604 }
0x16bd   :  { %4857 = vrcp.f32 %v2605_v61 }
0x16c0   :  { %v2763_v4 = vpop.permute.xlu0 %2762 }
0x16c3   :  { %v4856_v63 = vpop.eup %4855 }
0x16c4   :  { %v2608_v0 = vmul.f32 %v4856_v63, %v4852_v53 }
0x16c6   :  { %4564 = vmatmul.mubr.msk.f32.vlgmr.msra.gmra.mrb[24].mxu0 %vm274_vm6, %v2608_v0 }
0x16c7   :  { %v4858_v1 = vpop.eup %4857  ;;  %4572 = vmatpush3.xpose.msk.msra.mxu0 %vm274_vm6, %v2765_v62  ;;  %4573 = vmatprep.mubr.msk.f32.mxu0 %vm4909_vm5, %v4908_v16 }
0x16c8   :  { %v2609_v3 = vmul.f32 %v4858_v1, %v4854_v56  ;;  %4581 = vmatprep.subr.mxu0 %v4908_v16 }
0x16ca   :  { %4569 = vmatmul.mubr.msk.f32.vlgmr.msra.gmra.mrb[32].mxu1 %vm274_vm6, %v2609_v3  ;;  %4574 = vmatmul.mubr.msk.f32.vlgmr.msra.gmra.mrb[26].mxu0 %vm274_vm6, %v2763_v4 }
0x16cb   :  { %4577 = vmatpush3.xpose.msk.msra.mxu1 %vm274_vm6, %v2843_v2  ;;  %4578 = vmatprep.mubr.msk.f32.mxu1 %vm4909_vm5, %v4908_v16 }
0x16cc   :  { %4586 = vmatprep.subr.mxu1 %v4908_v16  ;;  %4583 = vmatprep.mubr.msk.f32.mxu0 %vm4909_vm5, %v4908_v16 }
0x16ce   :  { %4579 = vmatmul.mubr.msk.f32.vlgmr.msra.gmra.mrb[34].mxu1 %vm274_vm6, %v2841_v5 }
0x16cf   :  { %4588 = vmatprep.mubr.msk.f32.mxu1 %vm4909_vm5, %v4908_v16 }
0x1799   :  { %v5460_v6 = vpop.f32.mrb[24].mxu0 }
0x179a   :  { %v4565_v8 = vpop.f32.mrb[25].mxu0 }
0x179d   :  { %v5462_v10 = vpop.f32.mrb[32].mxu1  ;;  %v2836_v11 = vpop.f32.mrb[26].mxu0 }
0x179e   :  { %v2918_v12 = vmul.f32 0.35355338, %v2836_v11  ;;  %v4570_v13 = vpop.f32.mrb[33].mxu1  ;;  %v4575_v14 = vpop.f32.mrb[27].mxu0 }
0x17a0   :  { %v2920_v7 = vsel %vm274_vm6, %v2918_v12, -inf }
0x17a1   :  { %2921 = vmax.xlane.f32.xlu0 %v2920_v7  ;;  %v2914_v15 = vpop.f32.mrb[34].mxu1 }
0x17a2   :  { %v2919_v19 = vmul.f32 0.35355338, %v2914_v15  ;;  %v4580_v20 = vpop.f32.mrb[35].mxu1  ;;  %v4189_v15 = vld [vmem:[%s5663_s5 + $0x28] sm:$0xff] }
0x17a3   :  { %v4190_v20 = vld [vmem:[%s5663_s5 + $0x30] sm:$0xff] }
0x17a4   :  { %v2923_v21 = vsel %vm274_vm6, %v2919_v19, -inf }
0x17a5   :  { %2924 = vmax.xlane.f32.xlu1 %v2923_v21  ;;  %v4191_v21 = vld [vmem:[%s5663_s5 + $0x38] sm:$0xff] }
0x17b6   :  { %2942 = vrot.lane.b32.xlu1 %v5370_v60, %s5713_s23 }
0x17b7   :  { %3018 = vrot.lane.b32.xlu0 %v5368_v58, %s5713_s23 }
0x17ba   :  { %3096 = vrot.lane.b32.xlu1 %v5370_v60, %s5714_s20 }
0x17be   :  { %3174 = vrot.lane.b32.xlu1 %v5368_v58, %s5714_s20 }
0x17c2   :  { %3172 = vrot.lane.b32.xlu1 %v5368_v58, %s5715_s24 }
0x182e   :  { %v2922_v22 = vpop.xlane.xlu0 %2921 }
0x182f   :  { %v2926_v23 = vsub.f32 %v2918_v12, %v2922_v22  ;;  %v4741_v22 = vpack.c.bf16 %v4191_v21, %v4190_v20  ;;  %v4199_v21 = vld [vmem:[%s5666_s8 + $0x1] ss:$0 sm:$0xff] }
0x1831   :  { %v2928_v9 = vmul.f32 1.442695, %v2926_v23 }
0x1832   :  { %v3019_v24 = vpop.permute.xlu0 %3018  ;;  %v2925_v25 = vpop.xlane.xlu1 %2924 }
0x1833   :  { %4859 = vpow2.f32 %v2928_v9  ;;  %v2927_v26 = vsub.f32 %v2919_v19, %v2925_v25  ;;  %4587 = vmatpush3.msra.mxu1 %v3019_v24 }
0x1834   :  { %4596 = vmatprep.subr.mxu1 %v4908_v16 }
0x1835   :  { %v2930_v27 = vmul.f32 1.442695, %v2927_v26 }
0x1836   :  { %v2943_v28 = vpop.permute.xlu1 %2942 }
0x1837   :  { %4861 = vpow2.f32 %v2930_v27  ;;  %4582 = vmatpush3.msra.mxu0 %v2943_v28 }
0x1838   :  { %4591 = vmatprep.subr.mxu0 %v4908_v16 }
0x183a   :  { %v3097_v39 = vpop.permute.xlu1 %3096 }
0x183d   :  { %v4860_v29 = vpop.eup %4859 }
0x183e   :  { %v2932_v30 = vsel %vm274_vm6, %v4860_v29, 0.0  ;;  %v3175_v43 = vpop.permute.xlu1 %3174 }
0x183f   :  { %2933 = vadd.xlane.f32.xlu0 %v2932_v30 }
0x1841   :  { %v4862_v31 = vpop.eup %4861 }
0x1842   :  { %v2935_v35 = vsel %vm274_vm6, %v4862_v31, 0.0  ;;  %v3173_v37 = vpop.permute.xlu1 %3172 }
0x1843   :  { %2936 = vadd.xlane.f32.xlu0 %v2935_v35 }
0x1859   :  { %3094 = vrot.lane.b32.xlu0 %v5370_v60, %s5715_s24 }
0x18cc   :  { %v2934_v32 = vpop.xlane.xlu0 %2933 }
0x18cd   :  { %4863 = vrcp.f32 %v2934_v32 }
0x18d0   :  { %v2937_v36 = vpop.xlane.xlu0 %2936 }
0x18d1   :  { %4865 = vrcp.f32 %v2937_v36 }
0x18d4   :  { %v3095_v45 = vpop.permute.xlu0 %3094 }
0x18d7   :  { %v4864_v40 = vpop.eup %4863 }
0x18d8   :  { %v2940_v41 = vmul.f32 %v4864_v40, %v4860_v29 }
0x18da   :  { %4584 = vmatmul.mubr.msk.f32.vlgmr.msra.gmra.mrb[28].mxu0 %vm274_vm6, %v2940_v41 }
0x18db   :  { %v4866_v42 = vpop.eup %4865  ;;  %4592 = vmatpush3.xpose.msk.msra.mxu0 %vm274_vm6, %v3097_v39  ;;  %4593 = vmatprep.mubr.msk.f32.mxu0 %vm4909_vm5, %v4908_v16 }
0x18dc   :  { %v2941_v44 = vmul.f32 %v4866_v42, %v4862_v31  ;;  %4601 = vmatprep.subr.mxu0 %v4908_v16 }
0x18de   :  { %4589 = vmatmul.mubr.msk.f32.vlgmr.msra.gmra.mrb[36].mxu1 %vm274_vm6, %v2941_v44  ;;  %4594 = vmatmul.mubr.msk.f32.vlgmr.msra.gmra.mrb[30].mxu0 %vm274_vm6, %v3095_v45 }
0x18df   :  { %4597 = vmatpush3.xpose.msk.msra.mxu1 %vm274_vm6, %v3175_v43  ;;  %4598 = vmatprep.mubr.msk.f32.mxu1 %vm4909_vm5, %v4908_v16 }
0x18e0   :  { %4606 = vmatprep.subr.mxu1 %v4908_v16  ;;  %4603 = vmatprep.mubr.msk.f32.mxu0 %vm4909_vm5, %v4908_v16 }
0x18e2   :  { %4599 = vmatmul.mubr.msk.f32.vlgmr.msra.gmra.mrb[38].mxu1 %vm274_vm6, %v3173_v37 }
0x18e3   :  { %4608 = vmatprep.mubr.msk.f32.mxu1 %vm4909_vm5, %v4908_v16 }
0x19ad   :  { %v3014_v46 = vpop.f32.mrb[28].mxu0 }
0x19ae   :  { %v4585_v47 = vpop.f32.mrb[29].mxu0 }
0x19b1   :  { %v3090_v48 = vpop.f32.mrb[36].mxu1  ;;  %v3168_v49 = vpop.f32.mrb[30].mxu0 }
0x19b2   :  { %v3250_v50 = vmul.f32 0.35355338, %v3168_v49  ;;  %v4590_v51 = vpop.f32.mrb[37].mxu1  ;;  %v4595_v52 = vpop.f32.mrb[31].mxu0 }
0x19b4   :  { %v3252_v53 = vsel %vm274_vm6, %v3250_v50, -inf }
0x19b5   :  { %3253 = vmax.xlane.f32.xlu0 %v3252_v53  ;;  %v3246_v54 = vpop.f32.mrb[38].mxu1 }
0x19b6   :  { %v3251_v56 = vmul.f32 0.35355338, %v3246_v54  ;;  %v4600_v57 = vpop.f32.mrb[39].mxu1 }
0x19b8   :  { %v3255_v59 = vsel %vm274_vm6, %v3251_v56, -inf }
0x19b9   :  { %3256 = vmax.xlane.f32.xlu1 %v3255_v59  ;;  %v4201_v59 = vld [vmem:[%s5667_s9 + $0x28] sm:$0xff] }
0x19ca   :  { %3274 = vrot.lane.b32.xlu1 %v5370_v60, %s5716_s14 }
0x19ce   :  { %3428 = vrot.lane.b32.xlu1 %v5460_v6, %s5717_s21 }
0x19d2   :  { %3430 = vrot.lane.b32.xlu1 %v5462_v10, %s5717_s21 }
0x19d6   :  { %3438 = vrot.lane.b32.xlu1 %v3090_v48, %s5718_s27 }
0x1a42   :  { %v3254_v61 = vpop.xlane.xlu0 %3253 }
0x1a43   :  { %v3258_v62 = vsub.f32 %v3250_v50, %v3254_v61 }
0x1a45   :  { %v3260_v63 = vmul.f32 1.442695, %v3258_v62  ;;  %v4202_v62 = vld [vmem:[%s5667_s9 + $0x30] sm:$0xff] }
0x1a46   :  { %v3257_v0 = vpop.xlane.xlu1 %3256 }
0x1a47   :  { %4867 = vpow2.f32 %v3260_v63  ;;  %v3259_v1 = vsub.f32 %v3251_v56, %v3257_v0  ;;  %v4203_v63 = vld [vmem:[%s5667_s9 + $0x38] sm:$0xff] }
0x1a48   :  { %v4749_v0 = vpack.c.bf16 %v4203_v63, %v4202_v62  ;;  %v3841_v63 = vshrl.u32 %v65_v17, 7  ;;  %v4223_v17 = vld [vmem:[%s5710_s30 + $0x1] ss:$0 sm:$0xff] }
0x1a49   :  { %v3262_v2 = vmul.f32 1.442695, %v3259_v1  ;;  %v4208_v1 = vld [vmem:[%s5669_s11 + $0x40] sm:$0xff] }
0x1a4a   :  { %v3275_v3 = vpop.permute.xlu1 %3274 }
0x1a4b   :  { %4869 = vpow2.f32 %v3262_v2  ;;  %4602 = vmatpush3.msra.mxu0 %v3275_v3  ;;  %v4209_v2 = vld [vmem:[%s5669_s11 + $0x48] sm:$0xff]  ;;  %v4210_v3 = vld [vmem:[%s5669_s11 + $0x50] sm:$0xff] }
0x1a4e   :  { %v3429_v26 = vpop.permute.xlu1 %3428 }
0x1a4f   :  { %v3450_v29 = vsel %vm274_vm6, %v5422_v34, %v3429_v26  ;;  %v4193_v34 = vld [vmem:[%s5664_s6 + $0x1] ss:$0 sm:$0xff] }
0x1a51   :  { %v4868_v4 = vpop.eup %4867 }
0x1a52   :  { %v3264_v60 = vsel %vm274_vm6, %v4868_v4, 0.0  ;;  %v3431_v27 = vpop.permute.xlu1 %3430 }
0x1a53   :  { %3265 = vadd.xlane.f32.xlu0 %v3264_v60  ;;  %v3451_v36 = vsel %vm274_vm6, %v5424_v33, %v3431_v27  ;;  %v4211_v60 = vld [vmem:[%s5669_s11 + $0x58] sm:$0xff]  ;;  %v4214_v27 = vld [vmem:[%s5669_s11 + $0x70] sm:$0xff] }
0x1a55   :  { %v4870_v5 = vpop.eup %4869 }
0x1a56   :  { %v3267_v6 = vsel %vm274_vm6, %v4870_v5, 0.0  ;;  %v3439_v30 = vpop.permute.xlu1 %3438 }
0x1a57   :  { %3268 = vadd.xlane.f32.xlu0 %v3267_v6  ;;  %v3453_v39 = vsel %vm1624_vm8, %v3451_v36, %v3439_v30  ;;  %v4212_v6 = vld [vmem:[%s5669_s11 + $0x60] sm:$0xff] }
0x1a58   :  { %v4205_v30 = vld [vmem:[%s5668_s10 + $0x1] ss:$0 sm:$0xff] }
0x1a6d   :  { %3350 = vrot.lane.b32.xlu0 %v5368_v58, %s5716_s14  ;;  %v4188_v58 = vld [vmem:[%s5663_s5 + $0x20] sm:$0xff] }
0x1a6e   :  { %v4737_v19 = vpack.c.bf16 %v4189_v15, %v4188_v58 }
0x1a70   :  { %4738 = vmatprep.subr.bf16.mxu0 %v4737_v19 }
0x1a71   :  { %3436 = vrot.lane.b32.xlu0 %v3014_v46, %s5718_s27 }
0x1ae0   :  { %v3266_v8 = vpop.xlane.xlu0 %3265 }
0x1ae1   :  { %4871 = vrcp.f32 %v3266_v8  ;;  %v4213_v8 = vld [vmem:[%s5669_s11 + $0x68] sm:$0xff] }
0x1ae4   :  { %v3269_v10 = vpop.xlane.xlu0 %3268 }
0x1ae5   :  { %4873 = vrcp.f32 %v3269_v10  ;;  %v4761_v10 = vpack.c.bf16 %v4213_v8, %v4212_v6 }
0x1ae8   :  { %v3351_v11 = vpop.permute.xlu0 %3350 }
0x1ae9   :  { %4607 = vmatpush3.msra.mxu1 %v3351_v11 }
0x1aeb   :  { %v4872_v12 = vpop.eup %4871 }
0x1aec   :  { %v3272_v13 = vmul.f32 %v4872_v12, %v4868_v4  ;;  %v3437_v28 = vpop.permute.xlu0 %3436  ;;  %v4753_v4 = vpack.c.bf16 %v4209_v2, %v4208_v1  ;;  %v3844_v2 = vadd.s32 1, %v3841_v63 }
0x1aed   :  { %v3452_v31 = vsel %vm1624_vm8, %v3450_v29, %v3437_v28  ;;  %v4215_v28 = vld [vmem:[%s5669_s11 + $0x78] sm:$0xff] }
0x1aee   :  { %4604 = vmatmul.mubr.msk.f32.vlgmr.msra.gmra.mrb[32].mxu0 %vm274_vm6, %v3272_v13  ;;  %v4765_v29 = vpack.c.bf16 %v4215_v28, %v4214_v27  ;;  %v4226_v28 = vld [vmem:[%s5674_s16] ss:$0 sm:$0xff] }
0x1aef   :  { %v4874_v14 = vpop.eup %4873  ;;  %4740 = vmatpush3.bf16.msra.mxu0 %v4737_v19  ;;  %v4197_v19 = vld [vmem:[%s5665_s7 + $0x1] ss:$0 sm:$0xff] }
0x1af0   :  { %v3273_v7 = vmul.f32 %v4874_v14, %v4870_v5  ;;  %4742 = vmatprep.subr.bf16.mxu0 %v4741_v22  ;;  %v4757_v5 = vpack.c.bf16 %v4211_v60, %v4210_v3  ;;  %v3842_v3 = vmul.u32 8, %v3841_v63 }
0x1af2   :  { %4609 = vmatmul.mubr.msk.f32.vlgmr.msra.gmra.mrb[40].mxu1 %vm274_vm6, %v3273_v7  ;;  %vm3843_vm10 = vcmp.ge.s32.totalorder %v5064_v18, %v3842_v3 }
0x1af3   :  { %4744 = vmatpush3.bf16.msra.mxu0 %v4741_v22 }
0x1af4   :  { %4754 = vmatprep.subr.bf16.mxu0 %v4753_v4 }
0x1bc1   :  { %v3346_v23 = vpop.f32.mrb[32].mxu0 }
0x1bc2   :  { %3444 = vrot.lane.b32.xlu0 %v3346_v23, %s5719_s4  ;;  %v4605_v9 = vpop.f32.mrb[33].mxu0 }
0x1bc5   :  { %v3422_v24 = vpop.f32.mrb[40].mxu1 }
0x1bc6   :  { %3446 = vrot.lane.b32.xlu1 %v3422_v24, %s5719_s4  ;;  %v4610_v25 = vpop.f32.mrb[41].mxu1 }
0x1c34   :  { %v3445_v35 = vpop.permute.xlu0 %3444 }
0x1c35   :  { %v3454_v32 = vsel %vm1627_vm7, %v3452_v31, %v3445_v35 }
0x1c36   :  { %4619 = vmatprep.mubr.msk.f32.mxu0 %vm189_vm4, %v3454_v32 }
0x1c38   :  { %v3447_v40 = vpop.permute.xlu1 %3446 }
0x1c39   :  { %v3455_v41 = vsel %vm1627_vm7, %v3453_v39, %v3447_v40 }
0x1c3a   :  { %4620 = vmatmul.mubr.msk.f32.vlgmr.msra.gmra.mrb[34].mxu0 %vm189_vm4, %v3455_v41  ;;  %v4217_v41 = vld [vmem:[%s5670_s12 + $0x1] ss:$0 sm:$0xff] }
0x1c3b   :  { %4756 = vmatpush3.bf16.msra.mxu0 %v4753_v4  ;;  %v3845_v4 = vmul.u32 8, %v3844_v2 }
0x1c3c   :  { %4758 = vmatprep.subr.bf16.mxu0 %v4757_v5 }
0x1c3d   :  { %vm3846_vm11 = vcmp.lt.s32.totalorder %v5064_v18, %v3845_v4  ;;  %v3925_v18 = vld [vmem:[%s5673_s15 + $0x8] sm:$0xff] }
0x1c3e   :  { %vm3847_vm12 = vmand %vm3843_vm10, %vm3846_vm11 }
0x1c3f   :  { %4760 = vmatpush3.bf16.msra.mxu0 %v4757_v5  ;;  %v4221_v5 = vld [vmem:[%s5671_s13 + $0x1] ss:$0 sm:$0xff] }
0x1c40   :  { %4762 = vmatprep.subr.bf16.mxu0 %v4761_v10 }
0x1c43   :  { %4764 = vmatpush3.bf16.msra.mxu0 %v4761_v10 }
0x1c44   :  { %4766 = vmatprep.subr.bf16.mxu0 %v4765_v29 }
0x1c47   :  { %4768 = vmatpush3.bf16.msra.mxu0 %v4765_v29 }
0x1d0d   :  { %v4621_v42 = vpop.f32.mrb[34].mxu0 }
0x1d0e   :  { %v3547_v43 = vadd.f32 %v4621_v42, %v4193_v34  ;;  %v3541_v44 = vpop.f32.mrb[35].mxu0 }
0x1d0f   :  { %v3542_v45 = vadd.f32 %v4193_v34, %v3541_v44 }
0x1d10   :  { %v3551_v37 = vadd.f32 %v3547_v43, %v5357_v38 }
0x1d11   :  { %v3550_v46 = vadd.f32 %v3542_v45, %v5355_v55  ;;  %v4200_v55 = vld [vmem:[%s5667_s9 + $0x20] sm:$0xff] }
0x1d12   :  { %v3555_v33 = vsel %vm189_vm4, %v3551_v37, 0.0  ;;  %v4745_v61 = vpack.c.bf16 %v4201_v59, %v4200_v55 }
0x1d13   :  { %3556 = vadd.xlane.f32.xlu1 %v3555_v33  ;;  %v3552_v47 = vsel %vm189_vm4, %v3550_v46, 0.0 }
0x1d14   :  { %3553 = vadd.xlane.f32.xlu0 %v3552_v47  ;;  %4746 = vmatprep.subr.bf16.mxu1 %v4745_v61 }
0x1d15   :  { %4748 = vmatpush3.bf16.msra.mxu1 %v4745_v61 }
0x1d16   :  { %4750 = vmatprep.subr.bf16.mxu1 %v4749_v0 }
0x1d19   :  { %4752 = vmatpush3.bf16.msra.mxu1 %v4749_v0 }
0x1da0   :  { %v3557_v48 = vpop.xlane.xlu1 %3556 }
0x1da1   :  { %v3559_v49 = vmul.f32 0.03125, %v3557_v48  ;;  %v3554_v50 = vpop.xlane.xlu0 %3553 }
0x1da2   :  { %v3558_v51 = vmul.f32 0.03125, %v3554_v50 }
0x1da3   :  { %v3561_v52 = vsub.f32 %v3551_v37, %v3559_v49 }
0x1da4   :  { %v3560_v53 = vsub.f32 %v3550_v46, %v3558_v51 }
0x1da5   :  { %v3563_v57 = vmul.f32 %v3561_v52, %v3561_v52 }
0x1da6   :  { %v3562_v54 = vmul.f32 %v3560_v53, %v3560_v53 }
0x1da7   :  { %v3567_v38 = vsel %vm189_vm4, %v3563_v57, 0.0 }
0x1da8   :  { %v3564_v56 = vsel %vm189_vm4, %v3562_v54, 0.0 }
0x1da9   :  { %3565 = vadd.xlane.f32.xlu0 %v3564_v56 }
0x1dad   :  { %3568 = vadd.xlane.f32.xlu0 %v3567_v38  ;;  %v4924_v38 = vmov 0.0|0.0  }
0x1dae   :  { %4769 = vmatprep.subr.bf16.mxu1 %v4924_v38 }
0x1e36   :  { %v3566_v11 = vpop.xlane.xlu0 %3565 }
0x1e37   :  { %v3570_v12 = vmul.f32 0.03125, %v3566_v11 }
0x1e39   :  { %v3572_v13 = vadd.f32 1e-05, %v3570_v12 }
0x1e3a   :  { %v3569_v14 = vpop.xlane.xlu0 %3568 }
0x1e3b   :  { %4875 = vrsqrt.f32 %v3572_v13  ;;  %v3571_v7 = vmul.f32 0.03125, %v3569_v14 }
0x1e3d   :  { %v3573_v58 = vadd.f32 1e-05, %v3571_v7  ;;  %v4224_v7 = vsel %vm3847_vm12, 1.0, %v4908_v16 }
0x1e3f   :  { %4877 = vrsqrt.f32 %v3573_v58  ;;  %v3924_v58 = vld [vmem:[%s5673_s15] sm:$0xff] }
0x1e45   :  { %v4876_v15 = vpop.eup %4875 }
0x1e46   :  { %v3576_v20 = vmul.f32 %v4876_v15, %v3560_v53 }
0x1e48   :  { %v3586_v22 = vmul.f32 %v4197_v19, %v3576_v20  ;;  %v4773_v20 = vpack.c.bf16 %v3925_v18, %v3924_v58 }
0x1e49   :  { %v4878_v23 = vpop.eup %4877 }
0x1e4a   :  { %v3577_v9 = vmul.f32 %v4878_v23, %v3561_v52  ;;  %v3596_v24 = vadd.f32 %v4199_v21, %v3586_v22  ;;  %v3927_v22 = vld [vmem:[%s5673_s15 + $0x18] sm:$0xff] }
0x1e4c   :  { %v3587_v25 = vmul.f32 %v4197_v19, %v3577_v9  ;;  %4630 = vmatprep.mubr.msk.f32.mxu1 %vm189_vm4, %v3596_v24  ;;  %v3850_v19 = vmul.f32 0.125, %v4224_v7 }
0x1e4e   :  { %v3597_v26 = vadd.f32 %v4199_v21, %v3587_v25  ;;  %v3926_v21 = vld [vmem:[%s5673_s15 + $0x10] sm:$0xff]  ;;  %v4009_v25 = vld [vmem:[%s5675_s17] sm:$0xff] }
0x1e4f   :  { %v4776_v23 = vpack.c.bf16 %v3927_v22, %v3926_v21 }
0x1e50   :  { %4631 = vmatmul.mubr.msk.f32.vlgmr.msra.gmra.mrb[42].mxu1 %vm189_vm4, %v3597_v26 }
0x1e51   :  { %4656 = vmatprep.mubr.msk.f32.mxu1 %vm4909_vm5, %v4908_v16 }
0x1f23   :  { %v4632_v31 = vpop.f32.mrb[42].mxu1 }
0x1f24   :  { %v3689_v35 = vadd.f32 %v4632_v31, %v4205_v30  ;;  %v3683_v32 = vpop.f32.mrb[43].mxu1 }
0x1f25   :  { %v3684_v36 = vadd.f32 %v4205_v30, %v3683_v32 }
0x1f26   :  { %v3693_v40 = vmax.f32 %v3689_v35, 0.0  ;;  %v4228_v35 = vld [vmem:[%s5676_s18] ss:$0 sm:$0xff] }
0x1f27   :  { %v3692_v39 = vmax.f32 %v3684_v36, 0.0 }
0x1f29   :  { %4649 = vmatprep.mubr.msk.f32.mxu0 %vm1878_vm9, %v3692_v39 }
0x1f2a   :  { %4650 = vmatmul.mubr.msk.f32.vlgmr.msra.gmra.mrb[36].mxu0 %vm1878_vm9, %v3693_v40 }
0x1ffd   :  { %v4651_v34 = vpop.f32.mrb[36].mxu0 }
0x1ffe   :  { %v3789_v42 = vadd.f32 %v4651_v34, %v4217_v41  ;;  %v3783_v43 = vpop.f32.mrb[37].mxu0 }
0x1fff   :  { %v3784_v44 = vadd.f32 %v4217_v41, %v3783_v43 }
0x2000   :  { %v3793_v45 = vadd.f32 %v3789_v42, %v3597_v26  ;;  %v4010_v26 = vld [vmem:[%s5675_s17 + $0x8] sm:$0x3]  ;;  %s4926_s17 = smov [#allocation2]  }
0x2001   :  { %v3792_v37 = vadd.f32 %v3784_v44, %v3596_v24  ;;  %v4779_v27 = vpack.c.bf16 %v4010_v26, %v4009_v25  ;;  %s4103_s7 = sshll.u32 %s4926_s17, 4  ;;  %s4104_s7 = int_to_ptr.vmem [resolvable:$true] %s4103_s7 }
0x2002   :  { %v3797_v46 = vsel %vm189_vm4, %v3793_v45, 0.0  ;;  %s4883_s27 = scalar_lea.vmem %s4104_s7, 32  ;;  %p4888_p1 = scmp.lt.s32.totalorder %s4104_s7, %s4104_s7 }
0x2003   :  { %3798 = vadd.xlane.f32.xlu0 %v3797_v46  ;;  %v3794_v33 = vsel %vm189_vm4, %v3792_v37, 0.0  ;;  %p4884_p0 = scmp.ne.s32.totalorder %s4104_s7, %s4883_s27  ;;  %p4889_p2 = scmp.lt.s32.totalorder %s4883_s27, %s4883_s27 }
0x2004   :  { %3795 = vadd.xlane.f32.xlu1 %v3794_v33 }
0x2005   :  { %p4890_p3 = por %p4889_p2, %p4888_p1 }
0x2007   :  { %p4891_p4 = pnand %p4890_p3, %p4884_p0 }
0x2090   :  { %v3799_v47 = vpop.xlane.xlu0 %3798 }
0x2091   :  { %v3801_v48 = vmul.f32 0.03125, %v3799_v47  ;;  %v3796_v49 = vpop.xlane.xlu1 %3795 }
0x2092   :  { %v3800_v50 = vmul.f32 0.03125, %v3796_v49 }
0x2093   :  { %v3803_v51 = vsub.f32 %v3793_v45, %v3801_v48 }
0x2094   :  { %v3802_v52 = vsub.f32 %v3792_v37, %v3800_v50 }
0x2095   :  { %v3805_v53 = vmul.f32 %v3803_v51, %v3803_v51 }
0x2096   :  { %v3804_v54 = vmul.f32 %v3802_v52, %v3802_v52 }
0x2097   :  { %v3809_v56 = vsel %vm189_vm4, %v3805_v53, 0.0 }
0x2098   :  { %3810 = vadd.xlane.f32.xlu0 %v3809_v56  ;;  %v3806_v57 = vsel %vm189_vm4, %v3804_v54, 0.0 }
0x2099   :  { %3807 = vadd.xlane.f32.xlu1 %v3806_v57 }
0x2125   :  { %v3811_v55 = vpop.xlane.xlu0 %3810 }
0x2126   :  { %v3813_v59 = vmul.f32 0.03125, %v3811_v55  ;;  %v3808_v61 = vpop.xlane.xlu1 %3807 }
0x2127   :  { %v3812_v62 = vmul.f32 0.03125, %v3808_v61 }
0x2128   :  { %v3815_v0 = vadd.f32 1e-05, %v3813_v59 }
0x2129   :  { %v3814_v1 = vadd.f32 1e-05, %v3812_v62 }
0x212a   :  { %4879 = vrsqrt.f32 %v3815_v0 }
0x212b   :  { %4881 = vrsqrt.f32 %v3814_v1 }
0x2134   :  { %v4880_v60 = vpop.eup %4879 }
0x2135   :  { %v4882_v6 = vpop.eup %4881  ;;  %v3819_v8 = vmul.f32 %v4880_v60, %v3803_v51 }
0x2136   :  { %v3818_v10 = vmul.f32 %v4882_v6, %v3802_v52 }
0x2137   :  { %v3829_v11 = vmul.f32 %v4221_v5, %v3819_v8 }
0x2138   :  { %v3828_v12 = vmul.f32 %v4221_v5, %v3818_v10 }
0x2139   :  { %v3839_v13 = vadd.f32 %v4223_v17, %v3829_v11 }
0x213a   :  { %v3838_v14 = vadd.f32 %v4223_v17, %v3828_v12 }
0x213c   :  { %v4770_v15 = vpack.c.bf16 %v3839_v13, %v3838_v14 }
0x213e   :  { %4771 = vmatpush3.bf16.msra.mxu1 %v4770_v15 }
0x213f   :  { %4772 = vmatprep.subr.bf16.mxu1 %v4924_v38 }
0x2141   :  { %4657 = vmatmul.mubr.msk.f32.vlgmr.msra.gmra.mrb[44].mxu1 %vm1624_vm8, %v3850_v19 }
0x2142   :  { %4774 = vmatpush3.bf16.msra.mxu1 %v4773_v20  ;;  %4667 = vmatprep.mubr.msk.f32.mxu1 %vm4909_vm5, %v4908_v16 }
0x2143   :  { %4775 = vmatprep.subr.bf16.mxu1 %v4924_v38 }
0x2146   :  { %4777 = vmatpush3.bf16.msra.mxu1 %v4776_v23 }
0x2147   :  { %4778 = vmatprep.subr.bf16.mxu1 %v4924_v38 }
0x2214   :  { %v3920_v9 = vpop.f32.mrb[44].mxu1 }
0x2215   :  { %v4658_v24 = vpop.f32.mrb[45].mxu1  ;;  %4668 = vmatmul.mubr.msk.f32.vlgmr.msra.gmra.mrb[46].mxu1 %vm189_vm4, %v3920_v9 }
0x2216   :  { %4674 = vmatprep.mubr.msk.f32.mxu1 %vm4909_vm5, %v4908_v16  ;;  %4781 = vmatpush3.bf16.msk.msra.mxu1 %vm4780_vm14, %v4779_v27 }
0x22e8   :  { %v4004_v29 = vpop.f32.mrb[46].mxu1 }
0x22e9   :  { %v4005_v30 = vadd.f32 %v4226_v28, %v4004_v29  ;;  %v4669_v16 = vpop.f32.mrb[47].mxu1 }
0x22eb   :  { %v4008_v31 = vmax.f32 %v4005_v30, 0.0 }
0x22ed   :  { %4675 = vmatmul.mubr.msk.f32.vlgmr.msra.gmra.mrb[48].mxu1 %vm4018_vm15, %v4008_v31 }
0x23c0   :  { %v4091_v32 = vpop.f32.mrb[48].mxu1 }
0x23c1   :  { %v4092_v36 = vadd.f32 %v4228_v35, %v4091_v32  ;;  %v4676_v39 = vpop.f32.mrb[49].mxu1 }
0x23c3   :  { %4096 = vst.msk [vmem:[#allocation2] sm:$0x3] %vm4095_vm1, %v4092_v36 }
0x23c4   :  { %4894 = shalt.err (!%p4891_p4)
}
0x23c5   :  { %s4895_s8 = scalar_lea.hbm %s5677_s19, 32 }
0x23c6   :  { %p4896_p5 = scmp.ne.s32.totalorder %s5677_s19, %s4895_s8  ;;  %p4899_p6 = scmp.lt.u32.totalorder %s4895_s8, %s5677_s19 }
0x23c8   :  { %p4901_p7 = pnand %p4899_p6, %p4896_p5 }
0x23ca   :  { %4904 = shalt.err (!%p4901_p7)
}
0x23cb   :  { %4106 = dma.vmem_to_hbm [thread:$0]  %s4104_s7, 32, %s5677_s19, [#allocation3]  }
0x23cc   :  { %4905 = dma.done.wait [#allocation3], 32  }
0x23cd   :  { %4906 = vsyncadd [#allocation3], 4294967264 }
0x23ce   :  { %4110 = vsyncpa [#allocation3], 1 }

</bundles_post_ra>
